<compile_context>
chip_gen: v7x
topology: tpu7x:2x2x1
jax: 0.10.0
libtpu: 0.0.40
codegen_flags: <defaults>
</compile_context>

<pallas_src>
import functools

import jax
import jax.numpy as jnp
from jax.experimental import pallas as pl
from jax.experimental.pallas import tpu as pltpu

BN_EPS = 1e-5
LEAKY_SLOPE = 0.01                       # nn.LeakyReLU default
VMEM_LIMIT_BYTES = 48 * 1024 * 1024      # < 64 MiB/TC on v7x, << 128 MiB on v5e/v6e


def _leaky(x):
    return jnp.where(x > 0, x, LEAKY_SLOPE * x)


def _round_up(x, m):
    return (x + m - 1) // m * m


def _cdiv(a, b):
    return (a + b - 1) // b


# ------------------------ prep-time blocking choices -------------------------
def _vmem_budget_bytes(default=24 * 1024 * 1024):
    """Generation-aware budget for the streamed (fk-proportional) tiles.

    Stays well under the per-core VMEM (64 MiB on v7x, 128 MiB on v5e/v6e).
    Guarded: get_tpu_info is a backend query that may be unavailable."""
    try:
        cap = int(pltpu.get_tpu_info().vmem_capacity_bytes)
        if cap >= (32 << 20):
            return int(min(max(default, cap // 4), 40 << 20))
    except Exception:
        pass
    return default


def _choose_f_blocking(F, H, tb_max, f_chunk=None, budget_bytes=None):
    """Pick (fk, F_pad) once at parameter-prep time.

    fk is a multiple of 128 sized from the VMEM budget (largest double-buffered
    fk-proportional footprint of kernels 1 and 3); F_pad is the multiple of fk
    minimizing padding waste (e.g. F=51548 -> fk=3968, F_pad=51584, 0.07%
    waste), preferring large fk on ties (>= ~2K so per-step DMA stays large)."""
    if f_chunk is not None:
        fk = _round_up(f_chunk, 128)
        return fk, _round_up(F, fk)
    if budget_bytes is None:
        budget_bytes = _vmem_budget_bytes()
    # per-unit-of-fk double-buffered VMEM:
    #   kernel 1: x(tb,fk) bf16 + w1(fk,H) bf16
    #   kernel 3: wd3(H,fk) bf16 + bd3(1,fk) f32 + out(tb,fk) f32
    per_fk = 2 * max(tb_max * 2 + H * 2, H * 2 + 4 + tb_max * 4)
    fixed = 8 * 1024 * 1024            # acc scratch, (tb,H)/(tb,3L) tiles, headroom
    fk_max = max(256, (budget_bytes - fixed) // per_fk // 128 * 128)
    F_128 = _round_up(F, 128)
    fk_max = min(fk_max, F_128)
    fk_min = min(2048, fk_max)
    best_fk, best_pad = None, None
    for fk in range(fk_min, fk_max + 1, 128):
        F_pad = _round_up(F, fk)
        if best_fk is None or (F_pad, -fk) < (best_pad, -best_fk):
            best_fk, best_pad = fk, F_pad
    return best_fk, best_pad


# --------------------------------- kernels ----------------------------------
def _encoder_front_kernel(x_ref, w1_ref, b1_ref, h_ref, acc_ref, *, tb):
    """h = leaky(x @ W1' + b1') with the F reduction as the OUTER grid axis.

    A persistent (N_pad, H) f32 scratch holds one partial-sum row block per
    batch tile so W1 is streamed from HBM exactly once per forward."""
    k = pl.program_id(0)                  # F chunk (reduction)
    i = pl.program_id(1)                  # batch tile
    rows = pl.ds(pl.multiple_of(i * tb, tb), tb)

    part = jnp.dot(x_ref[...], w1_ref[...], preferred_element_type=jnp.float32)

    @pl.when(k == 0)
    def _():
        acc_ref[rows, :] = part

    @pl.when(k > 0)
    def _():
        acc_ref[rows, :] += part

    @pl.when(k == pl.num_programs(0) - 1)
    def _():
        h_ref[...] = _leaky(acc_ref[rows, :] + b1_ref[...]).astype(h_ref.dtype)


def _mid_kernel(h_ref, eps_ref, w23_ref, b23_ref, wmuv_ref, bmuv_ref,
                wd1_ref, bd1_ref, wd2_ref, bd2_ref, d_ref, zms_ref):
    """Small H-sized middle: encoder tail + latent head + decoder front."""
    f32 = jnp.float32
    bf16 = jnp.bfloat16
    L = eps_ref.shape[-1]

    # encoder tail: (Dropout = identity in eval) -> Linear -> Linear  (folded)
    h3 = jnp.dot(h_ref[...], w23_ref[...],
                 preferred_element_type=f32) + b23_ref[...]

    # NormalDistDecoder: mu / softplus(logvar) from one fused (H, 2L) matmul
    muv = jnp.dot(h3.astype(bf16), wmuv_ref[...],
                  preferred_element_type=f32) + bmuv_ref[...]
    mu = muv[:, :L]
    scale = jnp.logaddexp(muv[:, L:], 0.0)      # softplus
    z = mu + scale * eps_ref[...]               # Normal(mu, scale).rsample()

    # decoder front: Linear -> LeakyReLU -> (Dropout=id) -> Linear -> LeakyReLU
    d1 = _leaky(jnp.dot(z.astype(bf16), wd1_ref[...],
                        preferred_element_type=f32) + bd1_ref[...])
    d2 = _leaky(jnp.dot(d1.astype(bf16), wd2_ref[...],
                        preferred_element_type=f32) + bd2_ref[...])

    d_ref[...] = d2.astype(d_ref.dtype)
    # lane-dense packed small outputs: [ z | mu | scale ]
    zms_ref[:, 0:L] = z
    zms_ref[:, L:2 * L] = mu
    zms_ref[:, 2 * L:] = scale


def _decoder_back_kernel(d_ref, wd3_ref, bd3_ref, feats_ref):
    """feats chunk = d @ Wd3[:, chunk] + bd3[chunk]; F is the OUTER grid axis."""
    feats_ref[...] = (jnp.dot(d_ref[...], wd3_ref[...],
                              preferred_element_type=jnp.float32)
                      + bd3_ref[...]).astype(feats_ref.dtype)


# --------------------------- parameter preparation ---------------------------
def fold_params(p, *, weight_dtype=jnp.bfloat16, tb_max=256, f_chunk=None):
    """Fold eval-mode BatchNorms into the adjacent Linears, fuse w2@w3 and
    [wmu | wlv], cast weights to bf16, and pre-pad the two big streamed
    weights (w1, wd3, bd3) ONCE to the F blocking chosen here.

    Returns (fparams, cfg): fparams is a pytree of arrays (jit-traceable),
    cfg is a plain dict of Python ints to be passed STATICALLY to the forward
    (e.g. via functools.partial) so the grid/blocking always matches the
    prep-time padding."""
    f32 = jnp.float32
    F, H = p["w1"].shape
    L = p["wmu"].shape[1]
    fk, F_pad = _choose_f_blocking(F, H, tb_max, f_chunk=f_chunk)

    a1 = p["bn1_g"] * jax.lax.rsqrt(p["bn1_v"] + BN_EPS)          # (1, F)
    c1 = p["bn1_b"] - p["bn1_m"] * a1
    w1 = p["w1"] * a1.T                                           # (F, H)
    b1 = c1 @ p["w1"] + p["b1"]

    a2 = p["bn2_g"] * jax.lax.rsqrt(p["bn2_v"] + BN_EPS)          # (1, H)
    c2 = p["bn2_b"] - p["bn2_m"] * a2
    w2 = p["w2"] * a2.T
    b2 = c2 @ p["w2"] + p["b2"]
    w23 = w2 @ p["w3"]
    b23 = b2 @ p["w3"] + p["b3"]

    wmuv = jnp.concatenate([p["wmu"], p["wlv"]], axis=1)          # (H, 2L)
    bmuv = jnp.concatenate([p["bmu"], p["blv"]], axis=1)

    wd = weight_dtype
    w1p = jnp.pad(w1.astype(wd), ((0, F_pad - F), (0, 0)))        # (F_pad, H)
    wd3p = jnp.pad(p["wd3"].astype(wd), ((0, 0), (0, F_pad - F))) # (H, F_pad)
    bd3p = jnp.pad(p["bd3"].astype(f32), ((0, 0), (0, F_pad - F)))
    # TODO(synk): int8 (v5e/v6e) / fp8-e4m3 (v7x) storage for w1p/wd3p with
    #             per-channel scales folded into the f32 epilogue would halve
    #             the dominant HBM stream; kept bf16 to preserve numerics.

    fparams = {
        "w1": w1p, "b1": b1.astype(f32),
        "w23": w23.astype(wd), "b23": b23.astype(f32),
        "wmuv": wmuv.astype(wd), "bmuv": bmuv.astype(f32),
        "wd1": p["wd1"].astype(wd), "bd1": p["bd1"].astype(f32),
        "wd2": p["wd2"].astype(wd), "bd2": p["bd2"].astype(f32),
        "wd3": wd3p, "bd3": bd3p,
    }
    cfg = {"F": int(F), "F_pad": int(F_pad), "fk": int(fk),
           "H": int(H), "L": int(L), "tb_max": int(tb_max)}
    return fparams, cfg


# --------------------------------- forward ----------------------------------
def vposert_forward(features, eps, fparams, *, cfg, n_joints, feat_dim, tb=None):
    """features: (N, NJ, C) f32; eps: (N, L) f32 (rsample noise);
    fparams/cfg: output of fold_params() (cfg must be passed statically)."""
    f32, bf16 = jnp.float32, jnp.bfloat16
    N = features.shape[0]
    F, F_pad, fk = cfg["F"], cfg["F_pad"], cfg["fk"]
    H, L, tb_max = cfg["H"], cfg["L"], cfg["tb_max"]
    assert n_joints * feat_dim == F, "n_joints*feat_dim must match fold_params"
    assert fparams["w1"].shape == (F_pad, H), "fparams/cfg mismatch"

    # Batch tile: at most tb_max (the VMEM budget was derived for it); prefer
    # >= 2 batch tiles so a second TensorCore (v7x) has parallel work.
    tb = tb_max if tb is None else tb
    tb = max(16, min(_round_up(tb, 16), tb_max, _round_up(N, 16)))
    if N > 16 and _round_up(N, tb) == tb:
        tb = _round_up(_cdiv(N, 2), 16)
    N_pad = _round_up(N, tb)
    nb = N_pad // tb
    nf = F_pad // fk

    # BatchFlatten + bf16 cast + zero-pad (activations only; the big weights
    # were pre-padded once at prep time).  x MUST be zero-padded along F
    # because it feeds a reduction.
    x = features.reshape(N, F).astype(bf16)
    x = jnp.pad(x, ((0, N_pad - N), (0, F_pad - F)))
    eps_p = jnp.pad(eps.astype(f32), ((0, N_pad - N), (0, 0)))

    cp = lambda sem: pltpu.CompilerParams(dimension_semantics=sem,
                                          vmem_limit_bytes=VMEM_LIMIT_BYTES)

    # ---- kernel 1: encoder front (F reduction OUTER, W1 streamed once) ------
    k1_cost = pl.CostEstimate(
        flops=2 * N_pad * F_pad * H, transcendentals=0,
        bytes_accessed=N_pad * F_pad * 2 + F_pad * H * 2 + nf * N_pad * H * 2)
    h = pl.pallas_call(
        functools.partial(_encoder_front_kernel, tb=tb),
        out_shape=jax.ShapeDtypeStruct((N_pad, H), bf16),
        grid_spec=pltpu.PrefetchScalarGridSpec(
            num_scalar_prefetch=0,
            grid=(nf, nb),
            in_specs=[
                pl.BlockSpec((tb, fk), lambda k, i: (i, k)),
                pl.BlockSpec((fk, H), lambda k, i: (k, 0)),   # const over i
                pl.BlockSpec((1, H), lambda k, i: (0, 0)),
            ],
            out_specs=pl.BlockSpec((tb, H), lambda k, i: (i, 0)),
            scratch_shapes=[pltpu.VMEM((N_pad, H), f32)],
        ),
        # Batch axis is logically parallel, but declared "arbitrary" to keep
        # the (reduction-outer, batch-inner) ordering portable; the kernel is
        # HBM-bound on W1 so a single core already saturates the win.
        compiler_params=cp(("arbitrary", "arbitrary")),
        cost_estimate=k1_cost,
    )(x, fparams["w1"], fparams["b1"])

    # ---- kernel 2: small middle (weights fully resident, batch-tiled) -------
    full = lambda a: pl.BlockSpec(a.shape, lambda i: (0, 0))
    row = lambda c: pl.BlockSpec((tb, c), lambda i: (i, 0))
    d, zms = pl.pallas_call(
        _mid_kernel,
        out_shape=(jax.ShapeDtypeStruct((N_pad, H), bf16),
                   jax.ShapeDtypeStruct((N_pad, 3 * L), f32)),
        grid_spec=pltpu.PrefetchScalarGridSpec(
            num_scalar_prefetch=0,
            grid=(nb,),
            in_specs=[
                row(H), row(L),
                full(fparams["w23"]), full(fparams["b23"]),
                full(fparams["wmuv"]), full(fparams["bmuv"]),
                full(fparams["wd1"]), full(fparams["bd1"]),
                full(fparams["wd2"]), full(fparams["bd2"]),
            ],
            out_specs=(row(H), row(3 * L)),
        ),
        compiler_params=cp(("parallel",)),
    )(h, eps_p, fparams["w23"], fparams["b23"], fparams["wmuv"],
      fparams["bmuv"], fparams["wd1"], fparams["bd1"],
      fparams["wd2"], fparams["bd2"])

    # ---- kernel 3: decoder back (F output axis OUTER, Wd3 streamed once) ----
    # Output written directly at its exact (N, F) shape: the tail blocks along
    # both axes extend past the array and Pallas masks those stores (safe here
    # because every output element depends only on in-bounds d / Wd3 data).
    k3_cost = pl.CostEstimate(
        flops=2 * N_pad * F_pad * H, transcendentals=0,
        bytes_accessed=H * F_pad * 2 + nf * N_pad * H * 2 + N * F * 4)
    feats_flat = pl.pallas_call(
        _decoder_back_kernel,
        out_shape=jax.ShapeDtypeStruct((N, F), f32),
        grid_spec=pltpu.PrefetchScalarGridSpec(
            num_scalar_prefetch=0,
            grid=(nf, nb),
            in_specs=[
                pl.BlockSpec((tb, H), lambda k, i: (i, 0)),
                pl.BlockSpec((H, fk), lambda k, i: (0, k)),   # const over i
                pl.BlockSpec((1, fk), lambda k, i: (0, k)),
            ],
            out_specs=pl.BlockSpec((tb, fk), lambda k, i: (i, k)),
        ),
        compiler_params=cp(("parallel", "parallel")),
        cost_estimate=k3_cost,
    )(d, fparams["wd3"], fparams["bd3"])

    feats_rst = feats_flat.reshape(N, n_joints, feat_dim)  # ContinousRotReprDecoder
    z = zms[:N, :L]
    mu = zms[:N, L:2 * L]
    scale = zms[:N, 2 * L:]
    # torch: (feats_rst, (z.unsqueeze(0), Normal(mu, scale)))
    return feats_rst, (z[None], (mu, scale))


# ----------------------- deterministic parameter init -----------------------
def init_params(key, F, H, L):
    def lin(k, fan_in, fan_out):
        k1, k2 = jax.random.split(k)
        # torch.nn.Linear stores weight as (out, in); transpose for x @ W.
        w_pt = jax.random.normal(k1, (fan_out, fan_in), jnp.float32) * 0.05
        b = jax.random.normal(k2, (1, fan_out), jnp.float32) * 0.05
        return w_pt.T, b

    keys = jax.random.split(key, 12)
    params = {}
    params["bn1_g"] = 1.0 + 0.1 * jax.random.normal(keys[0], (1, F), jnp.float32)
    params["bn1_b"] = 0.1 * jax.random.normal(keys[1], (1, F), jnp.float32)
    params["bn1_m"] = 0.1 * jax.random.normal(keys[2], (1, F), jnp.float32)
    params["bn1_v"] = 1.0 + 0.1 * jax.random.uniform(keys[3], (1, F), jnp.float32)
    params["w1"], params["b1"] = lin(keys[4], F, H)
    params["bn2_g"] = 1.0 + 0.1 * jax.random.normal(keys[5], (1, H), jnp.float32)
    params["bn2_b"] = 0.1 * jax.random.normal(keys[6], (1, H), jnp.float32)
    params["bn2_m"] = 0.1 * jax.random.normal(keys[7], (1, H), jnp.float32)
    params["bn2_v"] = 1.0 + 0.1 * jax.random.uniform(keys[8], (1, H), jnp.float32)
    k = keys[9]
    for name, fi, fo in [("w2", H, H), ("w3", H, H), ("wmu", H, L), ("wlv", H, L),
                         ("wd1", L, H), ("wd2", H, H), ("wd3", H, F)]:
        k, sub = jax.random.split(k)
        params[name], params["b" + name[1:]] = lin(sub, fi, fo)
    return params


# ------------------------------- references ---------------------------------
def reference_forward_f32(features, eps, p, n_joints, feat_dim):
    """Unfolded f32 math; mirrors the PyTorch module in eval mode."""
    x = features.reshape(features.shape[0], -1)
    xh = (x - p["bn1_m"]) * jax.lax.rsqrt(p["bn1_v"] + BN_EPS) * p["bn1_g"] + p["bn1_b"]
    h = _leaky(xh @ p["w1"] + p["b1"])
    h = (h - p["bn2_m"]) * jax.lax.rsqrt(p["bn2_v"] + BN_EPS) * p["bn2_g"] + p["bn2_b"]
    h = h @ p["w2"] + p["b2"]
    h = h @ p["w3"] + p["b3"]
    mu = h @ p["wmu"] + p["bmu"]
    scale = jax.nn.softplus(h @ p["wlv"] + p["blv"])
    z = mu + scale * eps
    d = _leaky(z @ p["wd1"] + p["bd1"])
    d = _leaky(d @ p["wd2"] + p["bd2"])
    out = d @ p["wd3"] + p["bd3"]
    return out.reshape(-1, n_joints, feat_dim), z, mu, scale


def reference_forward_folded(features, eps, fp, cfg, n_joints, feat_dim):
    """Same folded / bf16-weight math as the kernels (tight numerical check)."""
    f32, bf16 = jnp.float32, jnp.bfloat16
    F, L = cfg["F"], cfg["L"]
    mm = lambda a, w: jnp.dot(a.astype(bf16), w, preferred_element_type=f32)
    x = features.reshape(features.shape[0], -1)
    h1 = _leaky(mm(x, fp["w1"][:F]) + fp["b1"]).astype(bf16)
    h3 = mm(h1, fp["w23"]) + fp["b23"]
    muv = mm(h3, fp["wmuv"]) + fp["bmuv"]
    mu = muv[:, :L]
    scale = jnp.logaddexp(muv[:, L:], 0.0)
    z = mu + scale * eps
    d1 = _leaky(mm(z, fp["wd1"]) + fp["bd1"])
    d2 = _leaky(mm(d1, fp["wd2"]) + fp["bd2"]).astype(bf16)
    out = mm(d2, fp["wd3"][:, :F]) + fp["bd3"][:, :F]
    return out.reshape(-1, n_joints, feat_dim), z, mu, scale


if __name__ == "__main__":
    # Small stand-in for the real config
    # (real: n_joints=196, feat_dim=263 -> F=51548, num_neurons=512, latentD=256).
    # FEAT_DIM=33 / BATCH=250 deliberately avoid 128/tb multiples so the
    # masked-tail output path and batch padding are exercised like the real F.
    N_JOINTS, FEAT_DIM = 8, 33          # F = 264
    NUM_NEURONS, LATENT_D = 128, 128
    BATCH = 250
    F = N_JOINTS * FEAT_DIM

    key = jax.random.PRNGKey(0)
    k_feat, k_eps, k_par = jax.random.split(key, 3)

    features = jax.random.normal(k_feat, (BATCH, N_JOINTS, FEAT_DIM), jnp.float32)
    eps = jax.random.normal(k_eps, (BATCH, LATENT_D), jnp.float32)   # rsample noise
    params = init_params(k_par, F, NUM_NEURONS, LATENT_D)

    # f_chunk=128 / tb_max=128 force multi-step F and batch grids even at
    # these tiny demo shapes (real config: defaults -> fk=3968, F_pad=51584).
    fparams, cfg = fold_params(params, tb_max=128, f_chunk=128)

    fwd = jax.jit(functools.partial(
        vposert_forward, cfg=cfg, n_joints=N_JOINTS, feat_dim=FEAT_DIM))
    feats_rst, (z_unsq, (mu, scale)) = jax.block_until_ready(
        fwd(features, eps, fparams))

    assert feats_rst.shape == (BATCH, N_JOINTS, FEAT_DIM)
    assert z_unsq.shape == (1, BATCH, LATENT_D)

    # tight check vs a pure-JAX reference using the same folded / bf16 math
    rf_feats, rf_z, rf_mu, rf_scale = reference_forward_folded(
        features, eps, fparams, cfg, N_JOINTS, FEAT_DIM)
    assert jnp.allclose(feats_rst, rf_feats, atol=5e-3, rtol=5e-3)
    assert jnp.allclose(z_unsq[0], rf_z, atol=5e-3, rtol=5e-3)
    assert jnp.allclose(mu, rf_mu, atol=5e-3, rtol=5e-3)
    assert jnp.allclose(scale, rf_scale, atol=5e-3, rtol=5e-3)

    # loose semantic check vs the original unfolded f32 math (bf16 rounding)
    r_feats, r_z, r_mu, r_scale = reference_forward_f32(
        features, eps, params, N_JOINTS, FEAT_DIM)
    assert jnp.allclose(feats_rst, r_feats, atol=5e-2, rtol=5e-2)
    assert jnp.allclose(mu, r_mu, atol=5e-2, rtol=5e-2)
    assert jnp.allclose(scale, r_scale, atol=5e-2, rtol=5e-2)

    print("KERNEL_OK")
</pallas_src>

<mosaic_0001>
module attributes {stable_mosaic.version = 11 : i64} {
  func.func @_encoder_front_kernel(%arg0: i32, %arg1: i32, %arg2: memref<128x128xbf16, #tpu.memory_space<vmem>>, %arg3: memref<128x128xbf16, #tpu.memory_space<vmem>>, %arg4: memref<1x128xf32, #tpu.memory_space<vmem>>, %arg5: memref<128x128xbf16, #tpu.memory_space<vmem>>, %arg6: memref<256x128xf32, #tpu.memory_space<vmem>>) attributes {dimension_semantics = [#tpu.dimension_semantics<arbitrary>, #tpu.dimension_semantics<arbitrary>], iteration_bounds = array<i64: 3, 2>, scalar_prefetch = 0 : i64, scratch_operands = 1 : i64, tpu.core_type = #tpu.core_type<tc>, window_params = [{transform_indices = @transform_0, window_bounds = array<i64: 128, 128>}, {transform_indices = @transform_1, window_bounds = array<i64: 128, 128>}, {pipeline_mode = #tpu.pipeline_mode<synchronous>, transform_indices = @transform_2, window_bounds = array<i64: 1, 128>}, {transform_indices = @transform_3, window_bounds = array<i64: 128, 128>}]} {
    %c128_i32 = arith.constant 128 : i32
    %0 = arith.muli %arg1, %c128_i32 : i32
    %1 = tpu.assume_multiple %0, 128 : i32
    %c0 = arith.constant 0 : index
    %c0_0 = arith.constant 0 : index
    %2 = vector.load %arg2[%c0, %c0_0] : memref<128x128xbf16, #tpu.memory_space<vmem>>, vector<128x128xbf16>
    %c0_1 = arith.constant 0 : index
    %c0_2 = arith.constant 0 : index
    %3 = vector.load %arg3[%c0_1, %c0_2] : memref<128x128xbf16, #tpu.memory_space<vmem>>, vector<128x128xbf16>
    %cst = arith.constant dense<0.000000e+00> : vector<128x128xf32>
    %4 = tpu.matmul %2, %3, %cst {dimension_numbers = #tpu.dot_dimension_numbers<[1], [0], [0], [1], [0, 0, 1, 1], [], []>} : vector<128x128xbf16>, vector<128x128xbf16>, vector<128x128xf32> -> vector<128x128xf32>
    %c0_i32 = arith.constant 0 : i32
    %5 = arith.cmpi eq, %arg0, %c0_i32 : i32
    %6 = arith.extui %5 : i1 to i32
    %c0_i32_3 = arith.constant 0 : i32
    %7 = arith.cmpi ne, %6, %c0_i32_3 : i32
    scf.if %7 {
      %14 = arith.index_cast %1 : i32 to index
      %c0_7 = arith.constant 0 : index
      %15 = vector.load %arg6[%14, %c0_7] : memref<256x128xf32, #tpu.memory_space<vmem>>, vector<128x128xf32>
      tpu.vector_store %arg6[%14, %c0_7], %4 {strides = array<i32>} : memref<256x128xf32, #tpu.memory_space<vmem>>, vector<128x128xf32>,
    } else {
    }
    %c0_i32_4 = arith.constant 0 : i32
    %8 = arith.cmpi sgt, %arg0, %c0_i32_4 : i32
    %9 = arith.extui %8 : i1 to i32
    %c0_i32_5 = arith.constant 0 : i32
    %10 = arith.cmpi ne, %9, %c0_i32_5 : i32
    scf.if %10 {
      %14 = arith.index_cast %1 : i32 to index
      %c0_7 = arith.constant 0 : index
      %15 = vector.load %arg6[%14, %c0_7] : memref<256x128xf32, #tpu.memory_space<vmem>>, vector<128x128xf32>
      %16 = arith.addf %15, %4 : vector<128x128xf32>
      %17 = arith.index_cast %1 : i32 to index
      %c0_8 = arith.constant 0 : index
      %18 = vector.load %arg6[%17, %c0_8] : memref<256x128xf32, #tpu.memory_space<vmem>>, vector<128x128xf32>
      tpu.vector_store %arg6[%17, %c0_8], %16 {strides = array<i32>} : memref<256x128xf32, #tpu.memory_space<vmem>>, vector<128x128xf32>,
    } else {
    }
    %c2_i32 = arith.constant 2 : i32
    %11 = arith.cmpi eq, %arg0, %c2_i32 : i32
    %12 = arith.extui %11 : i1 to i32
    %c0_i32_6 = arith.constant 0 : i32
    %13 = arith.cmpi ne, %12, %c0_i32_6 : i32
    scf.if %13 {
      %14 = arith.index_cast %1 : i32 to index
      %c0_7 = arith.constant 0 : index
      %15 = vector.load %arg6[%14, %c0_7] : memref<256x128xf32, #tpu.memory_space<vmem>>, vector<128x128xf32>
      %c0_8 = arith.constant 0 : index
      %c0_9 = arith.constant 0 : index
      %16 = vector.load %arg4[%c0_8, %c0_9] : memref<1x128xf32, #tpu.memory_space<vmem>>, vector<1x128xf32>
      %17 = vector.broadcast %16 : vector<1x128xf32> to vector<128x128xf32>
      %18 = arith.addf %15, %17 : vector<128x128xf32>
      %cst_10 = arith.constant 0.000000e+00 : f32
      %19 = vector.broadcast %cst_10 : f32 to vector<128x128xf32>
      %20 = arith.cmpf ogt, %18, %19 : vector<128x128xf32>
      %cst_11 = arith.constant 0.00999999977 : f32
      %21 = vector.broadcast %cst_11 : f32 to vector<128x128xf32>
      %22 = arith.mulf %21, %18 : vector<128x128xf32>
      %23 = arith.select %20, %18, %22 : vector<128x128xi1>, vector<128x128xf32>
      %24 = arith.truncf %23 : vector<128x128xf32> to vector<128x128xbf16>
      %c0_12 = arith.constant 0 : index
      %c0_13 = arith.constant 0 : index
      %25 = vector.load %arg5[%c0_12, %c0_13] : memref<128x128xbf16, #tpu.memory_space<vmem>>, vector<128x128xbf16>
      tpu.vector_store %arg5[%c0_12, %c0_13], %24 {strides = array<i32>} : memref<128x128xbf16, #tpu.memory_space<vmem>>, vector<128x128xbf16>,
    } else {
    }
    return
  }
  func.func @transform_0(%arg0: i32, %arg1: i32) -> (i32, i32) {
    %c0_i32 = arith.constant 0 : i32
    return %arg1, %arg0 : i32, i32
  }
  func.func @transform_1(%arg0: i32, %arg1: i32) -> (i32, i32) {
    %c0_i32 = arith.constant 0 : i32
    %c0_i32_0 = arith.constant 0 : i32
    return %arg0, %c0_i32 : i32, i32
  }
  func.func @transform_2(%arg0: i32, %arg1: i32) -> (i32, i32) {
    %c0_i32 = arith.constant 0 : i32
    %c0_i32_0 = arith.constant 0 : i32
    %c0_i32_1 = arith.constant 0 : i32
    return %c0_i32, %c0_i32_0 : i32, i32
  }
  func.func @transform_3(%arg0: i32, %arg1: i32) -> (i32, i32) {
    %c0_i32 = arith.constant 0 : i32
    %c0_i32_0 = arith.constant 0 : i32
    return %arg1, %c0_i32 : i32, i32
  }
}

module attributes {stable_mosaic.version = 11 : i64} {
  func.func @_mid_kernel(%arg0: i32, %arg1: memref<128x128xbf16, #tpu.memory_space<vmem>>, %arg2: memref<128x128xf32, #tpu.memory_space<vmem>>, %arg3: memref<128x128xbf16, #tpu.memory_space<vmem>>, %arg4: memref<1x128xf32, #tpu.memory_space<vmem>>, %arg5: memref<128x256xbf16, #tpu.memory_space<vmem>>, %arg6: memref<1x256xf32, #tpu.memory_space<vmem>>, %arg7: memref<128x128xbf16, #tpu.memory_space<vmem>>, %arg8: memref<1x128xf32, #tpu.memory_space<vmem>>, %arg9: memref<128x128xbf16, #tpu.memory_space<vmem>>, %arg10: memref<1x128xf32, #tpu.memory_space<vmem>>, %arg11: memref<128x128xbf16, #tpu.memory_space<vmem>>, %arg12: memref<128x384xf32, #tpu.memory_space<vmem>>) attributes {dimension_semantics = [#tpu.dimension_semantics<parallel>], iteration_bounds = array<i64: 2>, scalar_prefetch = 0 : i64, scratch_operands = 0 : i64, tpu.core_type = #tpu.core_type<tc>, window_params = [{transform_indices = @transform_0, window_bounds = array<i64: 128, 128>}, {transform_indices = @transform_1, window_bounds = array<i64: 128, 128>}, {pipeline_mode = #tpu.pipeline_mode<synchronous>, transform_indices = @transform_2, window_bounds = array<i64: 128, 128>}, {pipeline_mode = #tpu.pipeline_mode<synchronous>, transform_indices = @transform_3, window_bounds = array<i64: 1, 128>}, {pipeline_mode = #tpu.pipeline_mode<synchronous>, transform_indices = @transform_4, window_bounds = array<i64: 128, 256>}, {pipeline_mode = #tpu.pipeline_mode<synchronous>, transform_indices = @transform_5, window_bounds = array<i64: 1, 256>}, {pipeline_mode = #tpu.pipeline_mode<synchronous>, transform_indices = @transform_6, window_bounds = array<i64: 128, 128>}, {pipeline_mode = #tpu.pipeline_mode<synchronous>, transform_indices = @transform_7, window_bounds = array<i64: 1, 128>}, {pipeline_mode = #tpu.pipeline_mode<synchronous>, transform_indices = @transform_8, window_bounds = array<i64: 128, 128>}, {pipeline_mode = #tpu.pipeline_mode<synchronous>, transform_indices = @transform_9, window_bounds = array<i64: 1, 128>}, {transform_indices = @transform_10, window_bounds = array<i64: 128, 128>}, {transform_indices = @transform_11, window_bounds = array<i64: 128, 384>}]} {
    %c0 = arith.constant 0 : index
    %c0_0 = arith.constant 0 : index
    %0 = vector.load %arg1[%c0, %c0_0] : memref<128x128xbf16, #tpu.memory_space<vmem>>, vector<128x128xbf16>
    %c0_1 = arith.constant 0 : index
    %c0_2 = arith.constant 0 : index
    %1 = vector.load %arg3[%c0_1, %c0_2] : memref<128x128xbf16, #tpu.memory_space<vmem>>, vector<128x128xbf16>
    %cst = arith.constant dense<0.000000e+00> : vector<128x128xf32>
    %2 = tpu.matmul %0, %1, %cst {dimension_numbers = #tpu.dot_dimension_numbers<[1], [0], [0], [1], [0, 0, 1, 1], [], []>} : vector<128x128xbf16>, vector<128x128xbf16>, vector<128x128xf32> -> vector<128x128xf32>
    %c0_3 = arith.constant 0 : index
    %c0_4 = arith.constant 0 : index
    %3 = vector.load %arg4[%c0_3, %c0_4] : memref<1x128xf32, #tpu.memory_space<vmem>>, vector<1x128xf32>
    %4 = vector.broadcast %3 : vector<1x128xf32> to vector<128x128xf32>
    %5 = arith.addf %2, %4 : vector<128x128xf32>
    %6 = arith.truncf %5 : vector<128x128xf32> to vector<128x128xbf16>
    %c0_5 = arith.constant 0 : index
    %c0_6 = arith.constant 0 : index
    %7 = vector.load %arg5[%c0_5, %c0_6] : memref<128x256xbf16, #tpu.memory_space<vmem>>, vector<128x256xbf16>
    %cst_7 = arith.constant dense<0.000000e+00> : vector<128x256xf32>
    %8 = tpu.matmul %6, %7, %cst_7 {dimension_numbers = #tpu.dot_dimension_numbers<[1], [0], [0], [1], [0, 0, 1, 1], [], []>} : vector<128x128xbf16>, vector<128x256xbf16>, vector<128x256xf32> -> vector<128x256xf32>
    %c0_8 = arith.constant 0 : index
    %c0_9 = arith.constant 0 : index
    %9 = vector.load %arg6[%c0_8, %c0_9] : memref<1x256xf32, #tpu.memory_space<vmem>>, vector<1x256xf32>
    %10 = vector.broadcast %9 : vector<1x256xf32> to vector<128x256xf32>
    %11 = arith.addf %8, %10 : vector<128x256xf32>
    %12 = vector.extract_strided_slice %11 {offsets = [0, 0], sizes = [128, 128], strides = [1, 1]} : vector<128x256xf32> to vector<128x128xf32>
    %13 = vector.extract_strided_slice %11 {offsets = [0, 128], sizes = [128, 128], strides = [1, 1]} : vector<128x256xf32> to vector<128x128xf32>
    %cst_10 = arith.constant 0.000000e+00 : f32
    %14 = vector.broadcast %cst_10 : f32 to vector<128x128xf32>
    %15 = arith.maximumf %13, %14 : vector<128x128xf32>
    %16 = vector.broadcast %cst_10 : f32 to vector<128x128xf32>
    %17 = arith.subf %13, %16 : vector<128x128xf32>
    %18 = arith.cmpf one, %17, %17 : vector<128x128xf32>
    %19 = vector.broadcast %cst_10 : f32 to vector<128x128xf32>
    %20 = arith.addf %13, %19 : vector<128x128xf32>
    %21 = math.absf %17 : vector<128x128xf32>
    %cst_11 = arith.constant 0.000000e+00 : f32
    %22 = vector.broadcast %cst_11 : f32 to vector<128x128xf32>
    %23 = arith.subf %22, %21 : vector<128x128xf32>
    %24 = math.exp %23 : vector<128x128xf32>
    %25 = math.log1p %24 : vector<128x128xf32>
    %26 = arith.addf %15, %25 : vector<128x128xf32>
    %27 = arith.select %18, %20, %26 : vector<128x128xi1>, vector<128x128xf32>
    %c0_12 = arith.constant 0 : index
    %c0_13 = arith.constant 0 : index
    %28 = vector.load %arg2[%c0_12, %c0_13] : memref<128x128xf32, #tpu.memory_space<vmem>>, vector<128x128xf32>
    %29 = arith.mulf %27, %28 : vector<128x128xf32>
    %30 = arith.addf %12, %29 : vector<128x128xf32>
    %31 = arith.truncf %30 : vector<128x128xf32> to vector<128x128xbf16>
    %c0_14 = arith.constant 0 : index
    %c0_15 = arith.constant 0 : index
    %32 = vector.load %arg7[%c0_14, %c0_15] : memref<128x128xbf16, #tpu.memory_space<vmem>>, vector<128x128xbf16>
    %cst_16 = arith.constant dense<0.000000e+00> : vector<128x128xf32>
    %33 = tpu.matmul %31, %32, %cst_16 {dimension_numbers = #tpu.dot_dimension_numbers<[1], [0], [0], [1], [0, 0, 1, 1], [], []>} : vector<128x128xbf16>, vector<128x128xbf16>, vector<128x128xf32> -> vector<128x128xf32>
    %c0_17 = arith.constant 0 : index
    %c0_18 = arith.constant 0 : index
    %34 = vector.load %arg8[%c0_17, %c0_18] : memref<1x128xf32, #tpu.memory_space<vmem>>, vector<1x128xf32>
    %35 = vector.broadcast %34 : vector<1x128xf32> to vector<128x128xf32>
    %36 = arith.addf %33, %35 : vector<128x128xf32>
    %cst_19 = arith.constant 0.000000e+00 : f32
    %37 = vector.broadcast %cst_19 : f32 to vector<128x128xf32>
    %38 = arith.cmpf ogt, %36, %37 : vector<128x128xf32>
    %cst_20 = arith.constant 0.00999999977 : f32
    %39 = vector.broadcast %cst_20 : f32 to vector<128x128xf32>
    %40 = arith.mulf %39, %36 : vector<128x128xf32>
    %41 = arith.select %38, %36, %40 : vector<128x128xi1>, vector<128x128xf32>
    %42 = arith.truncf %41 : vector<128x128xf32> to vector<128x128xbf16>
    %c0_21 = arith.constant 0 : index
    %c0_22 = arith.constant 0 : index
    %43 = vector.load %arg9[%c0_21, %c0_22] : memref<128x128xbf16, #tpu.memory_space<vmem>>, vector<128x128xbf16>
    %cst_23 = arith.constant dense<0.000000e+00> : vector<128x128xf32>
    %44 = tpu.matmul %42, %43, %cst_23 {dimension_numbers = #tpu.dot_dimension_numbers<[1], [0], [0], [1], [0, 0, 1, 1], [], []>} : vector<128x128xbf16>, vector<128x128xbf16>, vector<128x128xf32> -> vector<128x128xf32>
    %c0_24 = arith.constant 0 : index
    %c0_25 = arith.constant 0 : index
    %45 = vector.load %arg10[%c0_24, %c0_25] : memref<1x128xf32, #tpu.memory_space<vmem>>, vector<1x128xf32>
    %46 = vector.broadcast %45 : vector<1x128xf32> to vector<128x128xf32>
    %47 = arith.addf %44, %46 : vector<128x128xf32>
    %cst_26 = arith.constant 0.000000e+00 : f32
    %48 = vector.broadcast %cst_26 : f32 to vector<128x128xf32>
    %49 = arith.cmpf ogt, %47, %48 : vector<128x128xf32>
    %cst_27 = arith.constant 0.00999999977 : f32
    %50 = vector.broadcast %cst_27 : f32 to vector<128x128xf32>
    %51 = arith.mulf %50, %47 : vector<128x128xf32>
    %52 = arith.select %49, %47, %51 : vector<128x128xi1>, vector<128x128xf32>
    %53 = arith.truncf %52 : vector<128x128xf32> to vector<128x128xbf16>
    %c0_28 = arith.constant 0 : index
    %c0_29 = arith.constant 0 : index
    %54 = vector.load %arg11[%c0_28, %c0_29] : memref<128x128xbf16, #tpu.memory_space<vmem>>, vector<128x128xbf16>
    tpu.vector_store %arg11[%c0_28, %c0_29], %53 {strides = array<i32>} : memref<128x128xbf16, #tpu.memory_space<vmem>>, vector<128x128xbf16>,
    %c0_30 = arith.constant 0 : index
    %c0_31 = arith.constant 0 : index
    %55 = vector.load %arg12[%c0_30, %c0_31] : memref<128x384xf32, #tpu.memory_space<vmem>>, vector<128x128xf32>
    tpu.vector_store %arg12[%c0_30, %c0_31], %30 {strides = array<i32>} : memref<128x384xf32, #tpu.memory_space<vmem>>, vector<128x128xf32>,
    %c0_32 = arith.constant 0 : index
    %c128 = arith.constant 128 : index
    %56 = vector.load %arg12[%c0_32, %c128] : memref<128x384xf32, #tpu.memory_space<vmem>>, vector<128x128xf32>
    tpu.vector_store %arg12[%c0_32, %c128], %12 {strides = array<i32>} : memref<128x384xf32, #tpu.memory_space<vmem>>, vector<128x128xf32>,
    %c0_33 = arith.constant 0 : index
    %c256 = arith.constant 256 : index
    %57 = vector.load %arg12[%c0_33, %c256] : memref<128x384xf32, #tpu.memory_space<vmem>>, vector<128x128xf32>
    tpu.vector_store %arg12[%c0_33, %c256], %27 {strides = array<i32>} : memref<128x384xf32, #tpu.memory_space<vmem>>, vector<128x128xf32>,
    return
  }
  func.func @transform_0(%arg0: i32) -> (i32, i32) {
    %c0_i32 = arith.constant 0 : i32
    %c0_i32_0 = arith.constant 0 : i32
    return %arg0, %c0_i32 : i32, i32
  }
  func.func @transform_1(%arg0: i32) -> (i32, i32) {
    %c0_i32 = arith.constant 0 : i32
    %c0_i32_0 = arith.constant 0 : i32
    return %arg0, %c0_i32 : i32, i32
  }
  func.func @transform_2(%arg0: i32) -> (i32, i32) {
    %c0_i32 = arith.constant 0 : i32
    %c0_i32_0 = arith.constant 0 : i32
    %c0_i32_1 = arith.constant 0 : i32
    return %c0_i32, %c0_i32_0 : i32, i32
  }
  func.func @transform_3(%arg0: i32) -> (i32, i32) {
    %c0_i32 = arith.constant 0 : i32
    %c0_i32_0 = arith.constant 0 : i32
    %c0_i32_1 = arith.constant 0 : i32
    return %c0_i32, %c0_i32_0 : i32, i32
  }
  func.func @transform_4(%arg0: i32) -> (i32, i32) {
    %c0_i32 = arith.constant 0 : i32
    %c0_i32_0 = arith.constant 0 : i32
    %c0_i32_1 = arith.constant 0 : i32
    return %c0_i32, %c0_i32_0 : i32, i32
  }
  func.func @transform_5(%arg0: i32) -> (i32, i32) {
    %c0_i32 = arith.constant 0 : i32
    %c0_i32_0 = arith.constant 0 : i32
    %c0_i32_1 = arith.constant 0 : i32
    return %c0_i32, %c0_i32_0 : i32, i32
  }
  func.func @transform_6(%arg0: i32) -> (i32, i32) {
    %c0_i32 = arith.constant 0 : i32
    %c0_i32_0 = arith.constant 0 : i32
    %c0_i32_1 = arith.constant 0 : i32
    return %c0_i32, %c0_i32_0 : i32, i32
  }
  func.func @transform_7(%arg0: i32) -> (i32, i32) {
    %c0_i32 = arith.constant 0 : i32
    %c0_i32_0 = arith.constant 0 : i32
    %c0_i32_1 = arith.constant 0 : i32
    return %c0_i32, %c0_i32_0 : i32, i32
  }
  func.func @transform_8(%arg0: i32) -> (i32, i32) {
    %c0_i32 = arith.constant 0 : i32
    %c0_i32_0 = arith.constant 0 : i32
    %c0_i32_1 = arith.constant 0 : i32
    return %c0_i32, %c0_i32_0 : i32, i32
  }
  func.func @transform_9(%arg0: i32) -> (i32, i32) {
    %c0_i32 = arith.constant 0 : i32
    %c0_i32_0 = arith.constant 0 : i32
    %c0_i32_1 = arith.constant 0 : i32
    return %c0_i32, %c0_i32_0 : i32, i32
  }
  func.func @transform_10(%arg0: i32) -> (i32, i32) {
    %c0_i32 = arith.constant 0 : i32
    %c0_i32_0 = arith.constant 0 : i32
    return %arg0, %c0_i32 : i32, i32
  }
  func.func @transform_11(%arg0: i32) -> (i32, i32) {
    %c0_i32 = arith.constant 0 : i32
    %c0_i32_0 = arith.constant 0 : i32
    return %arg0, %c0_i32 : i32, i32
  }
}

module attributes {stable_mosaic.version = 11 : i64} {
  func.func @_decoder_back_kernel(%arg0: i32, %arg1: i32, %arg2: memref<128x128xbf16, #tpu.memory_space<vmem>>, %arg3: memref<128x128xbf16, #tpu.memory_space<vmem>>, %arg4: memref<1x128xf32, #tpu.memory_space<vmem>>, %arg5: memref<128x128xf32, #tpu.memory_space<vmem>>) attributes {dimension_semantics = [#tpu.dimension_semantics<parallel>, #tpu.dimension_semantics<parallel>], iteration_bounds = array<i64: 3, 2>, scalar_prefetch = 0 : i64, scratch_operands = 0 : i64, tpu.core_type = #tpu.core_type<tc>, window_params = [{transform_indices = @transform_0, window_bounds = array<i64: 128, 128>}, {transform_indices = @transform_1, window_bounds = array<i64: 128, 128>}, {transform_indices = @transform_2, window_bounds = array<i64: 1, 128>}, {transform_indices = @transform_3, window_bounds = array<i64: 128, 128>}]} {
    %c0 = arith.constant 0 : index
    %c0_0 = arith.constant 0 : index
    %0 = vector.load %arg2[%c0, %c0_0] : memref<128x128xbf16, #tpu.memory_space<vmem>>, vector<128x128xbf16>
    %c0_1 = arith.constant 0 : index
    %c0_2 = arith.constant 0 : index
    %1 = vector.load %arg3[%c0_1, %c0_2] : memref<128x128xbf16, #tpu.memory_space<vmem>>, vector<128x128xbf16>
    %cst = arith.constant dense<0.000000e+00> : vector<128x128xf32>
    %2 = tpu.matmul %0, %1, %cst {dimension_numbers = #tpu.dot_dimension_numbers<[1], [0], [0], [1], [0, 0, 1, 1], [], []>} : vector<128x128xbf16>, vector<128x128xbf16>, vector<128x128xf32> -> vector<128x128xf32>
    %c0_3 = arith.constant 0 : index
    %c0_4 = arith.constant 0 : index
    %3 = vector.load %arg4[%c0_3, %c0_4] : memref<1x128xf32, #tpu.memory_space<vmem>>, vector<1x128xf32>
    %4 = vector.broadcast %3 : vector<1x128xf32> to vector<128x128xf32>
    %5 = arith.addf %2, %4 : vector<128x128xf32>
    %c0_5 = arith.constant 0 : index
    %c0_6 = arith.constant 0 : index
    %6 = vector.load %arg5[%c0_5, %c0_6] : memref<128x128xf32, #tpu.memory_space<vmem>>, vector<128x128xf32>
    tpu.vector_store %arg5[%c0_5, %c0_6], %5 {strides = array<i32>} : memref<128x128xf32, #tpu.memory_space<vmem>>, vector<128x128xf32>,
    return
  }
  func.func @transform_0(%arg0: i32, %arg1: i32) -> (i32, i32) {
    %c0_i32 = arith.constant 0 : i32
    %c0_i32_0 = arith.constant 0 : i32
    return %arg1, %c0_i32 : i32, i32
  }
  func.func @transform_1(%arg0: i32, %arg1: i32) -> (i32, i32) {
    %c0_i32 = arith.constant 0 : i32
    %c0_i32_0 = arith.constant 0 : i32
    return %c0_i32, %arg0 : i32, i32
  }
  func.func @transform_2(%arg0: i32, %arg1: i32) -> (i32, i32) {
    %c0_i32 = arith.constant 0 : i32
    %c0_i32_0 = arith.constant 0 : i32
    return %c0_i32, %arg0 : i32, i32
  }
  func.func @transform_3(%arg0: i32, %arg1: i32) -> (i32, i32) {
    %c0_i32 = arith.constant 0 : i32
    return %arg1, %arg0 : i32, i32
  }
}

</mosaic_0001>

<bundles_post_ra>
// kernel: vposert_forward.5
= control target key start
LH: loop header
LB: loop body
LE: loop exit
PB: predicated region body
PF: predicated region fallthrough
CT: control target
= control target key end

     0   :  { %s1040_s12 = smov 0   ;;  %s1042_s13 = smov 0   ;;  %s1245_s0 = inlined_call_operand.vmem [shape: bf16[256,128], index: 0, kind: input, shape index: {}]   ;;  %s1246_s1 = inlined_call_operand.vmem [shape: bf16[128,384], index: 1, kind: input, shape index: {}]   ;;  %s1247_s2 = inlined_call_operand.vmem [shape: f32[1,384], index: 2, kind: input, shape index: {}]   ;;  %s1248_s3 = inlined_call_operand.vmem [shape: f32[250,264], index: 3, kind: output, shape index: {}]  }
   0x1   :  { %s1044_s14 = smov 0   ;;  %s1046_s15 = smov 0  }
   0x2   :  { %s1048_s16 = smov 0   ;;  %s1050_s17 = smov 0  }
   0x3   :  { %s1052_s18 = smov 0   ;;  %s1054_s19 = smov 0  }
   0x4   :  { %s1056_s20 = smov 0  }
   0x5 LB: > { %s22_s21 = sadd.s32 1, %s1010_s18  ;;  %s25_s22 = sadd.s32 1, %s1014_s19  ;;  %s1018_s20 = sphi %s1056_s20, %s13_s20   ;;  %s1014_s19 = sphi %s1054_s19, %s1258_s19   ;;  %s1010_s18 = sphi %s1052_s18, %s1257_s18   ;;  %s1006_s17 = sphi %s1050_s17, %s1256_s17   ;;  %s1002_s16 = sphi %s1048_s16, %s1255_s16   ;;  %s998_s15 = sphi %s1046_s15, %s1254_s15   ;;  %s994_s14 = sphi %s1044_s14, %s1253_s14   ;;  %s990_s13 = sphi %s1042_s13, %s1252_s13   ;;  %s986_s12 = sphi %s1040_s12, %s1251_s12  }
   0x6   : > { %p23_p0 = scmp.ge.s32.totalorder %s22_s21, 2  ;;  %p65_p1 = scmp.ne.s32.totalorder %s998_s15, %s994_s14 }
   0x7   : > { %s761_s23 = sadd.s32 4294967295, %s1018_s20   ;;  %p66_p2 = scmp.eq.s32.totalorder %s1018_s20, 0 }
   0x8   : > { %s1260_s21 = smov (%p23_p0, %s22_s21), 0  ;;  %s1262_s22 = smov (!%p23_p0, %s25_s22), %s1014_s19 }
   0x9   : > { %p27_p3 = scmp.ge.s32.totalorder %s1262_s22, 3  ;;  %s107_s24 = ssub.s32 %s1010_s18, %s1260_s21 }
   0xa   : > { %p1096_p4 = por %p66_p2, %p65_p1  ;;  %p122_p5 = scmp.ne.s32.totalorder %s990_s13, %s986_s12 }
   0xb   : > { %s1264_s22 = smov (%p27_p3, %s1262_s22), 0  ;;  %s58_s26 = sadd.s32 1, %s998_s15 }
   0xc   : > { %p123_p6 = scmp.eq.s32.totalorder %s761_s23, 5  ;;  %s55_s27 = ssub.s32 %s1014_s19, %s1264_s22 }
   0xd   : > { %s112_s28 = sadd.s32 1, %s990_s13  ;;  %p56_p7 = scmp.eq.s32.totalorder %s55_s27, 0 }
   0xe   : > { %s109_s29 = sor.u32 %s107_s24, %s55_s27  ;;  %p1108_p9 = por %p123_p6, %p122_p5 }
   0xf   : > { %p110_p8 = scmp.eq.s32.totalorder %s109_s29, 0  ;;  %p764_p10 = scmp.ge.s32.totalorder %s1018_s20, 6 }
  0x10   : > { %s1113_s4 = scalar_select %p56_p7, %s998_s15, %s58_s26  }
  0x11   : > { %s1116_s5 = scalar_select %p110_p8, %s990_s13, %s112_s28  }
  0x12   : > { %145 = sbr.rel (%p764_p10) target bundleno = 39 (0x27), region = 16 }
  0x19   : > { %157 = sbr.rel (!%p1096_p4) target bundleno = 39 (0x27), region = 24  ;;  %s159_s6 = sand.u32 (%p1096_p4), 1, %s998_s15  }
  0x1a   : > { %s766_s7 = sshll.u32 (%p1096_p4), %s1014_s19, 2  ;;  %s765_s8 = sshll.u32 (%p1096_p4), %s159_s6, 6 }
  0x1b   : > { %s1126_s11 = scalar_lea.vmem (%p1096_p4), %s1246_s1, %s766_s7  ;;  %s161_s23 = scalar_lea.vmem (%p1096_p4), [#allocation2], %s765_s8 }
  0x1c   : > { %v179_v0 = vld [vmem:[%s1126_s11] sm:$0xf] (%p1096_p4)  ;;  %v181_v1 = vld [vmem:[%s1126_s11 + $0xc] sm:$0xf] (%p1096_p4)  ;;  %v183_v2 = vld [vmem:[%s1126_s11 + $0x18] sm:$0xf] (%p1096_p4) }
  0x1d   : > { %180 = vst [vmem:[%s161_s23] sm:$0xf] (%p1096_p4), %v179_v0  ;;  %182 = vst [vmem:[%s161_s23 + $0x4] sm:$0xf] (%p1096_p4), %v181_v1  ;;  %v185_v3 = vld [vmem:[%s1126_s11 + $0x24] sm:$0xf] (%p1096_p4) }
  0x1e   : > { %v187_v4 = vld [vmem:[%s1126_s11 + $0x30] sm:$0xf] (%p1096_p4)  ;;  %184 = vst [vmem:[%s161_s23 + $0x8] sm:$0xf] (%p1096_p4), %v183_v2  ;;  %186 = vst [vmem:[%s161_s23 + $0xc] sm:$0xf] (%p1096_p4), %v185_v3 }
  0x1f   : > { %188 = vst [vmem:[%s161_s23 + $0x10] sm:$0xf] (%p1096_p4), %v187_v4  ;;  %v189_v5 = vld [vmem:[%s1126_s11 + $0x3c] sm:$0xf] (%p1096_p4)  ;;  %v191_v6 = vld [vmem:[%s1126_s11 + $0x48] sm:$0xf] (%p1096_p4) }
  0x20   : > { %v193_v7 = vld [vmem:[%s1126_s11 + $0x54] sm:$0xf]  ;;  %190 = vst [vmem:[%s161_s23 + $0x14] sm:$0xf] %v189_v5  ;;  %192 = vst [vmem:[%s161_s23 + $0x18] sm:$0xf] %v191_v6 }
  0x21   : > { %194 = vst [vmem:[%s161_s23 + $0x1c] sm:$0xf] %v193_v7  ;;  %v195_v8 = vld [vmem:[%s1126_s11 + $0x60] sm:$0xf]  ;;  %v197_v9 = vld [vmem:[%s1126_s11 + $0x6c] sm:$0xf] }
  0x22   : > { %v199_v10 = vld [vmem:[%s1126_s11 + $0x78] sm:$0xf]  ;;  %196 = vst [vmem:[%s161_s23 + $0x20] sm:$0xf] %v195_v8  ;;  %198 = vst [vmem:[%s161_s23 + $0x24] sm:$0xf] %v197_v9 }
  0x23   : > { %200 = vst [vmem:[%s161_s23 + $0x28] sm:$0xf] %v199_v10  ;;  %v201_v11 = vld [vmem:[%s1126_s11 + $0x84] sm:$0xf]  ;;  %v203_v12 = vld [vmem:[%s1126_s11 + $0x90] sm:$0xf] }
  0x24   : > { %v205_v13 = vld [vmem:[%s1126_s11 + $0x9c] sm:$0xf]  ;;  %202 = vst [vmem:[%s161_s23 + $0x2c] sm:$0xf] %v201_v11  ;;  %204 = vst [vmem:[%s161_s23 + $0x30] sm:$0xf] %v203_v12 }
  0x25   : > { %206 = vst [vmem:[%s161_s23 + $0x34] sm:$0xf] %v205_v13  ;;  %v207_v14 = vld [vmem:[%s1126_s11 + $0xa8] sm:$0xf]  ;;  %v209_v15 = vld [vmem:[%s1126_s11 + $0xb4] sm:$0xf] }
  0x26   : > { %208 = vst [vmem:[%s161_s23 + $0x38] sm:$0xf] %v207_v14  ;;  %210 = vst [vmem:[%s161_s23 + $0x3c] sm:$0xf] %v209_v15 }
  0x27 PF: > { %p767_p11 = scmp.ge.s32.totalorder %s1018_s20, 1  ;;  %p270_p12 = scmp.lt.s32.totalorder %s1018_s20, 7 }
  0x29   : > { %p271_p13 = pnand %p767_p11, %p270_p12 }
  0x2a   : > { %s277_s24 = sand.u32 (!%p271_p13), 1, %s994_s14   ;;  %s770_s25 = sshll.u32 (!%p271_p13), %s1002_s16, 4 }
  0x2b   : > { %274 = sbr.rel (%p271_p13) target bundleno = 313 (0x139), region = 69  ;;  %s768_s26 = sshll.u32 (!%p271_p13), %s277_s24, 6 }
  0x2c   : > { %p308_p0 = scmp.lt.s32.totalorder (!%p271_p13), %s770_s25, 31  ;;  %s1148_s27 = scalar_lea.vmem (!%p271_p13), [#allocation2], %s768_s26 }
  0x2d   : > { %v932_v16 = vld [vmem:[%s1148_s27] sm:$0xff] (!%p271_p13)   ;;  %v933_v17 = vld [vmem:[%s1148_s27 + $0x8] sm:$0xff] (!%p271_p13)   ;;  %v934_v18 = vld [vmem:[%s1148_s27 + $0x10] sm:$0xff] (!%p271_p13)   ;;  %p313_p1 = scmp.lt.s32.totalorder (!%p271_p13), %s1006_s17, 2  ;;  %s304_s8 = sand.u32 (!%p271_p13), 1, %s986_s12  }
  0x2e   : > { %811 = vmatprep.subr.bf16.mxu0 (!%p271_p13), %v932_v16  ;;  %843 = vmatprep.subr.bf16.mxu1 (!%p271_p13), %v932_v16  ;;  %v935_v19 = vld [vmem:[%s1148_s27 + $0x18] sm:$0xff] (!%p271_p13)   ;;  %v936_v22 = vld [vmem:[%s1148_s27 + $0x20] sm:$0xff] (!%p271_p13)   ;;  %v937_v23 = vld [vmem:[%s1148_s27 + $0x28] sm:$0xff] (!%p271_p13)   ;;  %s769_s23 = sshll.u32 (!%p271_p13), %s304_s8, 7 }
  0x2f   : > { %812 = vmatpush3.bf16.msra.mxu0 (!%p271_p13), %v932_v16  ;;  %851 = vmatpush3.bf16.msra.mxu1 (!%p271_p13), %v932_v16  ;;  %v938_v24 = vld [vmem:[%s1148_s27 + $0x30] sm:$0xff] (!%p271_p13)   ;;  %v939_v25 = vld [vmem:[%s1148_s27 + $0x38] sm:$0xff] (!%p271_p13)   ;;  %s1177_s24 = scalar_lea.vmem (!%p271_p13), [#allocation3], %s769_s23 }
  0x30   : > { %813 = vmatprep.subr.bf16.mxu0 (!%p271_p13), %v933_v17  ;;  %844 = vmatprep.subr.bf16.mxu1 (!%p271_p13), %v933_v17 }
  0x32   : > { %s1266_s25 = smov (!%p308_p0, %s770_s25), 31  ;;  %s859_s12 = smul.u32 (%p1108_p9), 48, %s1002_s16 }
  0x33   : > { %s771_s28 = sshll.u32 %s1266_s25, 2  ;;  %814 = vmatpush3.bf16.msra.mxu0 %v933_v17  ;;  %852 = vmatpush3.bf16.msra.mxu1 %v933_v17 }
  0x34   : > { %s1156_s6 = scalar_lea.vmem %s1245_s0, %s771_s28  ;;  %815 = vmatprep.subr.bf16.mxu0 %v934_v18  ;;  %845 = vmatprep.subr.bf16.mxu1 %v934_v18  ;;  %s575_s30 = sadd.s32 (%p1108_p9), %s1006_s17, %s859_s12 }
  0x35   : > { %v940_v20 = vld [vmem:[%s1156_s6] sm:$0xff]   ;;  %v942_v26 = vld [vmem:[%s1156_s6 + $0x8] sm:$0xff]   ;;  %v944_v28 = vld [vmem:[%s1156_s6 + $0x10] sm:$0xff]   ;;  %s314_s7 = scalar_select %p313_p1, %s1006_s17, 2 }
  0x36   : > { %v941_v21 = vld [vmem:[%s1156_s6 + $0x20] sm:$0xff]   ;;  %827 = vmatprep.mubr.bf16.mxu0 %v940_v20  ;;  %v943_v27 = vld [vmem:[%s1156_s6 + $0x28] sm:$0xff]   ;;  %v945_v29 = vld [vmem:[%s1156_s6 + $0x30] sm:$0xff]   ;;  %s792_s25 = sshll.u32 (%p1108_p9), %s575_s30, 3 }
  0x37   : > { %816 = vmatpush3.bf16.msra.mxu0 %v934_v18  ;;  %853 = vmatpush3.bf16.msra.mxu1 %v934_v18  ;;  %v946_v30 = vld [vmem:[%s1156_s6 + $0x18] sm:$0xff]   ;;  %s315_s11 = scalar_lea.vmem %s1247_s2, %s314_s7  ;;  %s577_s16 = scalar_lea.vmem (%p1108_p9), %s1248_s3, %s792_s25 }
  0x38   : > { %817 = vmatprep.subr.bf16.mxu0 %v935_v19  ;;  %846 = vmatprep.subr.bf16.mxu1 %v935_v19  ;;  %v947_v31 = vld [vmem:[%s1156_s6 + $0x38] sm:$0xff]   ;;  %v772_v32 = vld [vmem:[%s315_s11] ss:$0 sm:$0xff] }
  0x39   : > { %835 = vmatprep.mubr.bf16.mxu1 %v941_v21 }
  0x3b   : > { %818 = vmatpush3.bf16.msra.mxu0 %v935_v19  ;;  %854 = vmatpush3.bf16.msra.mxu1 %v935_v19 }
  0x3c   : > { %819 = vmatprep.subr.bf16.mxu0 %v936_v22  ;;  %847 = vmatprep.subr.bf16.mxu1 %v936_v22 }
  0x3f   : > { %820 = vmatpush3.bf16.msra.mxu0 %v936_v22  ;;  %855 = vmatpush3.bf16.msra.mxu1 %v936_v22 }
  0x40   : > { %821 = vmatprep.subr.bf16.mxu0 %v937_v23  ;;  %848 = vmatprep.subr.bf16.mxu1 %v937_v23 }
  0x43   : > { %822 = vmatpush3.bf16.msra.mxu0 %v937_v23  ;;  %856 = vmatpush3.bf16.msra.mxu1 %v937_v23 }
  0x44   : > { %823 = vmatprep.subr.bf16.mxu0 %v938_v24  ;;  %849 = vmatprep.subr.bf16.mxu1 %v938_v24 }
  0x47   : > { %824 = vmatpush3.bf16.msra.mxu0 %v938_v24  ;;  %857 = vmatpush3.bf16.msra.mxu1 %v938_v24 }
  0x48   : > { %825 = vmatprep.subr.bf16.mxu0 %v939_v25  ;;  %850 = vmatprep.subr.bf16.mxu1 %v939_v25 }
  0x4b   : > { %826 = vmatpush3.bf16.msra.mxu0 %v939_v25  ;;  %858 = vmatpush3.bf16.msra.mxu1 %v939_v25 }
  0x4e   : > { %828 = vmatmul.mubr.bf16.vlgmr.msra.gmra.mrb[0].mxu0 %v942_v26  ;;  %836 = vmatmul.mubr.bf16.vlgmr.msra.gmra.mrb[0].mxu1 %v943_v27 }
  0x4f   : > { %831 = vmatprep.mubr.bf16.mxu0 %v944_v28  ;;  %839 = vmatprep.mubr.bf16.mxu1 %v945_v29 }
  0x56   : > { %832 = vmatmul.mubr.bf16.gmra.mrb[4].mxu0 %v946_v30  ;;  %840 = vmatmul.mubr.bf16.gmra.mrb[4].mxu1 %v947_v31 }
 0x121   : > { %v829_v33 = vpop.f32.mrb[0].mxu0  ;;  %v837_v34 = vpop.f32.mrb[0].mxu1 }
 0x122   : > { %v496_v35 = vadd.f32 %v829_v33, %v772_v32  ;;  %v528_v36 = vadd.f32 %v837_v34, %v772_v32  ;;  %v487_v37 = vpop.f32.mrb[1].mxu0  ;;  %v519_v38 = vpop.f32.mrb[1].mxu1 }
 0x123   : > { %v488_v39 = vadd.f32 %v772_v32, %v487_v37  ;;  %v520_v40 = vadd.f32 %v772_v32, %v519_v38  ;;  %v830_v41 = vpop.f32.mrb[2].mxu0  ;;  %v838_v42 = vpop.f32.mrb[2].mxu1 }
 0x124   : > { %552 = vst [vmem:[%s1177_s24 + $0x10] sm:$0xff] %v496_v35  ;;  %560 = vst [vmem:[%s1177_s24 + $0x50] sm:$0xff] %v528_v36  ;;  %v499_v43 = vadd.f32 %v830_v41, %v772_v32  ;;  %v531_v44 = vadd.f32 %v838_v42, %v772_v32  ;;  %v490_v45 = vpop.f32.mrb[3].mxu0  ;;  %v522_v46 = vpop.f32.mrb[3].mxu1 }
 0x125   : > { %550 = vst [vmem:[%s1177_s24] sm:$0xff] %v488_v39  ;;  %558 = vst [vmem:[%s1177_s24 + $0x40] sm:$0xff] %v520_v40  ;;  %v491_v47 = vadd.f32 %v772_v32, %v490_v45  ;;  %v523_v48 = vadd.f32 %v772_v32, %v522_v46 }
 0x126   : > { %553 = vst [vmem:[%s1177_s24 + $0x18] sm:$0xff] %v499_v43  ;;  %561 = vst [vmem:[%s1177_s24 + $0x58] sm:$0xff] %v531_v44 }
 0x127   : > { %551 = vst [vmem:[%s1177_s24 + $0x8] sm:$0xff] %v491_v47  ;;  %559 = vst [vmem:[%s1177_s24 + $0x48] sm:$0xff] %v523_v48 }
 0x129   : > { %v833_v49 = vpop.f32.mrb[4].mxu0  ;;  %v841_v50 = vpop.f32.mrb[4].mxu1  ;;  %572 = sbr.rel (!%p1108_p9) target bundleno = 313 (0x139), region = 77 }
 0x12a   : > { %v512_v51 = vadd.f32 %v833_v49, %v772_v32  ;;  %v544_v52 = vadd.f32 %v841_v50, %v772_v32  ;;  %v503_v53 = vpop.f32.mrb[5].mxu0  ;;  %v535_v54 = vpop.f32.mrb[5].mxu1 }
 0x12b   : > { %v504_v55 = vadd.f32 %v772_v32, %v503_v53  ;;  %v536_v56 = vadd.f32 %v772_v32, %v535_v54  ;;  %v834_v57 = vpop.f32.mrb[6].mxu0  ;;  %v842_v58 = vpop.f32.mrb[6].mxu1  ;;  %v639_v3 = vld [vmem:[%s1177_s24 + $0x10] sm:$0xff] (%p1108_p9) }
 0x12c   : > { %556 = vst [vmem:[%s1177_s24 + $0x30] sm:$0xff] %v512_v51  ;;  %564 = vst [vmem:[%s1177_s24 + $0x70] sm:$0xff] %v544_v52  ;;  %v515_v59 = vadd.f32 %v834_v57, %v772_v32  ;;  %v547_v60 = vadd.f32 %v842_v58, %v772_v32  ;;  %v506_v61 = vpop.f32.mrb[7].mxu0  ;;  %v538_v62 = vpop.f32.mrb[7].mxu1  ;;  %v635_v1 = vld [vmem:[%s1177_s24] sm:$0xff] (%p1108_p9)  ;;  %v655_v11 = vld [vmem:[%s1177_s24 + $0x50] sm:$0xff] (%p1108_p9) }
 0x12d   : > { %554 = vst [vmem:[%s1177_s24 + $0x20] sm:$0xff] %v504_v55  ;;  %562 = vst [vmem:[%s1177_s24 + $0x60] sm:$0xff] %v536_v56  ;;  %v507_v63 = vadd.f32 %v772_v32, %v506_v61  ;;  %v539_v0 = vadd.f32 %v772_v32, %v538_v62  ;;  %v641_v4 = vld [vmem:[%s1177_s24 + $0x18] sm:$0xff] (%p1108_p9)  ;;  %v651_v9 = vld [vmem:[%s1177_s24 + $0x40] sm:$0xff] (%p1108_p9) }
 0x12e   : > { %557 = vst [vmem:[%s1177_s24 + $0x38] sm:$0xff] %v515_v59  ;;  %565 = vst [vmem:[%s1177_s24 + $0x78] sm:$0xff] %v547_v60  ;;  %v637_v2 = vld [vmem:[%s1177_s24 + $0x8] sm:$0xff] (%p1108_p9)  ;;  %v657_v12 = vld [vmem:[%s1177_s24 + $0x58] sm:$0xff] (%p1108_p9) }
 0x12f   : > { %555 = vst [vmem:[%s1177_s24 + $0x28] sm:$0xff] %v507_v63  ;;  %563 = vst [vmem:[%s1177_s24 + $0x68] sm:$0xff] %v539_v0  ;;  %v653_v10 = vld [vmem:[%s1177_s24 + $0x48] sm:$0xff] (%p1108_p9) }
 0x130   : > { %636 = vst [vmem:[%s577_s16] sm:$0xff] %v635_v1  ;;  %638 = vst [vmem:[%s577_s16 + $0x18] sm:$0xff] %v637_v2 }
 0x131   : > { %640 = vst [vmem:[%s577_s16 + $0x30] sm:$0xff] %v639_v3  ;;  %642 = vst [vmem:[%s577_s16 + $0x48] sm:$0xff] %v641_v4 }
 0x132   : > { %652 = vst [vmem:[%s577_s16 + $0xc0] sm:$0xff] %v651_v9  ;;  %654 = vst [vmem:[%s577_s16 + $0xd8] sm:$0xff] %v653_v10 }
 0x133   : > { %v647_v7 = vld [vmem:[%s1177_s24 + $0x30] sm:$0xff]  ;;  %656 = vst [vmem:[%s577_s16 + $0xf0] sm:$0xff] %v655_v11  ;;  %658 = vst [vmem:[%s577_s16 + $0x108] sm:$0xff] %v657_v12 }
 0x134   : > { %v643_v5 = vld [vmem:[%s1177_s24 + $0x20] sm:$0xff]  ;;  %v663_v15 = vld [vmem:[%s1177_s24 + $0x70] sm:$0xff]  ;;  %648 = vst [vmem:[%s577_s16 + $0x90] sm:$0xff] %v647_v7 }
 0x135   : > { %v649_v8 = vld [vmem:[%s1177_s24 + $0x38] sm:$0xff]  ;;  %v659_v13 = vld [vmem:[%s1177_s24 + $0x60] sm:$0xff]  ;;  %644 = vst [vmem:[%s577_s16 + $0x60] sm:$0xff] %v643_v5  ;;  %664 = vst [vmem:[%s577_s16 + $0x150] sm:$0xff] %v663_v15 }
 0x136   : > { %v645_v6 = vld [vmem:[%s1177_s24 + $0x28] sm:$0xff]  ;;  %650 = vst [vmem:[%s577_s16 + $0xa8] sm:$0xff] %v649_v8  ;;  %660 = vst [vmem:[%s577_s16 + $0x120] sm:$0xff] %v659_v13  ;;  %v665_v16 = vld [vmem:[%s1177_s24 + $0x78] sm:$0xff] }
 0x137   : > { %v661_v14 = vld [vmem:[%s1177_s24 + $0x68] sm:$0xff]  ;;  %646 = vst [vmem:[%s577_s16 + $0x78] sm:$0xff] %v645_v6  ;;  %666 = vst [vmem:[%s577_s16 + $0x168] sm:$0xff] %v665_v16 }
 0x138   : > { %662 = vst [vmem:[%s577_s16 + $0x138] sm:$0xff] %v661_v14 }
 0x139 PF: > { %s13_s20 = sadd.s32 1, %s1018_s20   ;;  %s1251_s12 = smov %s990_s13 }
 0x13a   : > { %p10_p2 = scmp.ge.s32.totalorder %s13_s20, 8   ;;  %s1252_s13 = smov %s1116_s5 }
 0x13b   : > { %s1253_s14 = smov %s998_s15  ;;  %s1254_s15 = smov %s1113_s4 }
 0x13c   : > { %s1255_s16 = smov %s1010_s18  ;;  %s1256_s17 = smov %s1014_s19 }
 0x13d   : > { %s1257_s18 = smov %s1260_s21  ;;  %s1258_s19 = smov %s1264_s22 }
 0x13e   :  { %12 = sbr.rel (!%p10_p2) target bundleno = 5 (0x5), region = 152 }

// kernel: vposert_forward.3
= control target key start
LH: loop header
LB: loop body
LE: loop exit
PB: predicated region body
PF: predicated region fallthrough
CT: control target
= control target key end

     0   :  { %s1209_s12 = smov 0   ;;  %s1211_s13 = smov 0   ;;  %s1452_s0 = inlined_call_operand.vmem [shape: bf16[256,384], index: 0, kind: input, shape index: {}]   ;;  %s1453_s1 = inlined_call_operand.vmem [shape: bf16[384,128], index: 1, kind: input, shape index: {}]   ;;  %s1454_s2 = inlined_call_operand.vmem [shape: f32[1,128], index: 2, kind: input, shape index: {}]   ;;  %s1455_s3 = inlined_call_operand.vmem [shape: bf16[256,128], index: 3, kind: output, shape index: {}]  }
   0x1   :  { %s1213_s14 = smov 0   ;;  %s1215_s15 = smov 0  }
   0x2   :  { %s1217_s16 = smov 0   ;;  %s1219_s17 = smov 0  }
   0x3   :  { %s1221_s18 = smov 0  }
   0x4 LB: > { %s22_s19 = sadd.s32 1, %s1179_s16  ;;  %s25_s20 = sadd.s32 1, %s1183_s17  ;;  %s1187_s18 = sphi %s1221_s18, %s13_s18   ;;  %s1183_s17 = sphi %s1219_s17, %s1461_s17   ;;  %s1179_s16 = sphi %s1217_s16, %s1460_s16   ;;  %s1175_s15 = sphi %s1215_s15, %s1459_s15   ;;  %s1171_s14 = sphi %s1213_s14, %s1458_s14   ;;  %s1167_s13 = sphi %s1211_s13, %s1457_s13   ;;  %s1163_s12 = sphi %s1209_s12, %s1456_s12  }
   0x5   : > { %p23_p0 = scmp.ge.s32.totalorder %s22_s19, 2  ;;  %p41_p1 = scmp.ne.s32.totalorder %s1167_s13, %s1163_s12 }
   0x6   : > { %p42_p2 = scmp.eq.s32.totalorder %s1187_s18, 0  ;;  %s34_s24 = sadd.s32 1, %s1167_s13 }
   0x7   : > { %s1463_s19 = smov (%p23_p0, %s22_s19), 0  ;;  %s1465_s20 = smov (!%p23_p0, %s25_s20), %s1183_s17 }
   0x8   : > { %p43_p3 = por %p42_p2, %p41_p1  ;;  %p27_p4 = scmp.ge.s32.totalorder %s1465_s20, 3 }
   0x9   : > { %s29_s21 = ssub.s32 %s1179_s16, %s1463_s19  ;;  %p883_p6 = scmp.ge.s32.totalorder %s1187_s18, 6 }
   0xa   : > { %s1467_s20 = smov (%p27_p4, %s1465_s20), 0 }
   0xb   : > { %s30_s22 = ssub.s32 %s1183_s17, %s1467_s20  ;;  %143 = sbr.rel (%p883_p6) target bundleno = 35 (0x23), region = 20 }
   0xc   : > { %s31_s23 = sor.u32 %s30_s22, %s29_s21 }
   0xd   : > { %p32_p5 = scmp.eq.s32.totalorder %s31_s23, 0 }
   0xf   : > { %s1260_s25 = scalar_select %p32_p5, %s1167_s13, %s34_s24  }
  0x12   : > { %146 = sbr.rel (!%p43_p3) target bundleno = 35 (0x23), region = 24  ;;  %s148_s26 = sand.u32 (%p43_p3), 1, %s1167_s13  }
  0x13   : > { %s1060_s27 = smul.u32 (%p43_p3), 48, %s1179_s16  ;;  %s884_s28 = sshll.u32 (%p43_p3), %s148_s26, 6 }
  0x14   : > { %s150_s7 = scalar_lea.vmem (%p43_p3), [#allocation3], %s884_s28 }
  0x15   : > { %s153_s29 = sadd.s32 (%p43_p3), %s1183_s17, %s1060_s27 }
  0x16   : > { %s887_s30 = sshll.u32 (%p43_p3), %s153_s29, 2 }
  0x17   : > { %s1269_s6 = scalar_lea.vmem (%p43_p3), %s1452_s0, %s887_s30 }
  0x18   : > { %v171_v0 = vld [vmem:[%s1269_s6] sm:$0xf] (%p43_p3)  ;;  %v173_v1 = vld [vmem:[%s1269_s6 + $0xc] sm:$0xf] (%p43_p3)  ;;  %v175_v2 = vld [vmem:[%s1269_s6 + $0x18] sm:$0xf] (%p43_p3) }
  0x19   : > { %172 = vst [vmem:[%s150_s7] sm:$0xf] %v171_v0  ;;  %174 = vst [vmem:[%s150_s7 + $0x4] sm:$0xf] %v173_v1  ;;  %v177_v3 = vld [vmem:[%s1269_s6 + $0x24] sm:$0xf] }
  0x1a   : > { %176 = vst [vmem:[%s150_s7 + $0x8] sm:$0xf] %v175_v2  ;;  %v179_v4 = vld [vmem:[%s1269_s6 + $0x30] sm:$0xf]  ;;  %v181_v5 = vld [vmem:[%s1269_s6 + $0x3c] sm:$0xf] }
  0x1b   : > { %178 = vst [vmem:[%s150_s7 + $0xc] sm:$0xf] %v177_v3  ;;  %180 = vst [vmem:[%s150_s7 + $0x10] sm:$0xf] %v179_v4  ;;  %v183_v6 = vld [vmem:[%s1269_s6 + $0x48] sm:$0xf] }
  0x1c   : > { %182 = vst [vmem:[%s150_s7 + $0x14] sm:$0xf] %v181_v5  ;;  %v185_v7 = vld [vmem:[%s1269_s6 + $0x54] sm:$0xf]  ;;  %v187_v8 = vld [vmem:[%s1269_s6 + $0x60] sm:$0xf] }
  0x1d   : > { %184 = vst [vmem:[%s150_s7 + $0x18] sm:$0xf] %v183_v6  ;;  %186 = vst [vmem:[%s150_s7 + $0x1c] sm:$0xf] %v185_v7  ;;  %v189_v9 = vld [vmem:[%s1269_s6 + $0x6c] sm:$0xf] }
  0x1e   : > { %188 = vst [vmem:[%s150_s7 + $0x20] sm:$0xf] %v187_v8  ;;  %v191_v10 = vld [vmem:[%s1269_s6 + $0x78] sm:$0xf]  ;;  %v193_v11 = vld [vmem:[%s1269_s6 + $0x84] sm:$0xf] }
  0x1f   : > { %190 = vst [vmem:[%s150_s7 + $0x24] sm:$0xf] %v189_v9  ;;  %192 = vst [vmem:[%s150_s7 + $0x28] sm:$0xf] %v191_v10  ;;  %v195_v12 = vld [vmem:[%s1269_s6 + $0x90] sm:$0xf] }
  0x20   : > { %194 = vst [vmem:[%s150_s7 + $0x2c] sm:$0xf] %v193_v11  ;;  %v197_v13 = vld [vmem:[%s1269_s6 + $0x9c] sm:$0xf]  ;;  %v199_v14 = vld [vmem:[%s1269_s6 + $0xa8] sm:$0xf] }
  0x21   : > { %196 = vst [vmem:[%s150_s7 + $0x30] sm:$0xf] %v195_v12  ;;  %198 = vst [vmem:[%s150_s7 + $0x34] sm:$0xf] %v197_v13  ;;  %v201_v15 = vld [vmem:[%s1269_s6 + $0xb4] sm:$0xf] }
  0x22   : > { %200 = vst [vmem:[%s150_s7 + $0x38] sm:$0xf] %v199_v14  ;;  %202 = vst [vmem:[%s150_s7 + $0x3c] sm:$0xf] %v201_v15 }
  0x23 PF: > { %p888_p7 = scmp.ge.s32.totalorder %s1187_s18, 1  ;;  %p265_p8 = scmp.lt.s32.totalorder %s1187_s18, 7 }
  0x25   : > { %p266_p9 = pnand %p888_p7, %p265_p8 }
  0x26   : > { %s890_s8 = sshll.u32 (!%p266_p9), %s1175_s15, 4  ;;  %s892_s9 = sshll.u32 (!%p266_p9), %s1171_s14, 4 }
  0x27   : > { %269 = sbr.rel (%p266_p9) target bundleno = 353 (0x161), region = 69  ;;  %p302_p10 = scmp.lt.s32.totalorder (!%p266_p9), %s890_s8, 47 }
  0x28   : > { %p308_p11 = scmp.lt.s32.totalorder (!%p266_p9), %s892_s9, 31  ;;  %s1292_s10 = sshll.u32 (!%p266_p9), %s1171_s14, 7 }
  0x29   : > { %s272_s21 = sand.u32 (!%p266_p9), 1, %s1163_s12   ;;  %p911_p12 = scmp.ne.s32.totalorder (!%p266_p9), %s1175_s15, 0 }
  0x2a   : > { %s889_s12 = sshll.u32 (!%p266_p9), %s272_s21, 6 }
  0x2b   : > { %s1309_s14 = scalar_lea.vmem (!%p266_p9), [#allocation3], %s889_s12 }
  0x2c   : > { %v1125_v20 = vld [vmem:[%s1309_s14] sm:$0xff] (!%p266_p9)   ;;  %v1127_v26 = vld [vmem:[%s1309_s14 + $0x8] sm:$0xff] (!%p266_p9)   ;;  %v1129_v28 = vld [vmem:[%s1309_s14 + $0x10] sm:$0xff] (!%p266_p9)  }
  0x2d   : > { %v1126_v21 = vld [vmem:[%s1309_s14 + $0x20] sm:$0xff] (!%p266_p9)   ;;  %1028 = vmatprep.mubr.bf16.mxu0 (!%p266_p9), %v1125_v20  ;;  %v1128_v27 = vld [vmem:[%s1309_s14 + $0x28] sm:$0xff] (!%p266_p9)   ;;  %v1130_v29 = vld [vmem:[%s1309_s14 + $0x30] sm:$0xff] (!%p266_p9)  }
  0x2e   : > { %s1469_s8 = smov (!%p302_p10, %s890_s8), 47  ;;  %s1471_s9 = smov (!%p308_p11, %s892_s9), 31  ;;  %1036 = vmatprep.mubr.bf16.mxu1 %v1126_v21  ;;  %v1131_v30 = vld [vmem:[%s1309_s14 + $0x18] sm:$0xff]  }
  0x2f   : > { %s891_s11 = sshll.u32 %s1469_s8, 2  ;;  %s893_s26 = sshll.u32 %s1471_s9, 2  ;;  %v1132_v31 = vld [vmem:[%s1309_s14 + $0x38] sm:$0xff]  }
  0x30   : > { %s1298_s24 = scalar_lea.vmem %s1453_s1, %s891_s11  ;;  %s1303_s29 = scalar_lea.vmem %s1455_s3, %s893_s26 }
  0x31   : > { %v1117_v16 = vld [vmem:[%s1298_s24] sm:$0xff]   ;;  %v1118_v17 = vld [vmem:[%s1298_s24 + $0x8] sm:$0xff]   ;;  %v1119_v18 = vld [vmem:[%s1298_s24 + $0x10] sm:$0xff]   ;;  %s544_s30 = scalar_lea.vmem (!%p911_p12), [#allocation2], %s1292_s10 }
  0x32   : > { %1012 = vmatprep.subr.bf16.mxu0 %v1117_v16  ;;  %1044 = vmatprep.subr.bf16.mxu1 %v1117_v16  ;;  %v1120_v19 = vld [vmem:[%s1298_s24 + $0x18] sm:$0xff]   ;;  %v1121_v22 = vld [vmem:[%s1298_s24 + $0x20] sm:$0xff]   ;;  %v1122_v23 = vld [vmem:[%s1298_s24 + $0x28] sm:$0xff]  }
  0x33   : > { %1013 = vmatpush3.bf16.msra.mxu0 %v1117_v16  ;;  %1052 = vmatpush3.bf16.msra.mxu1 %v1117_v16  ;;  %v1123_v24 = vld [vmem:[%s1298_s24 + $0x30] sm:$0xff]   ;;  %v1124_v25 = vld [vmem:[%s1298_s24 + $0x38] sm:$0xff]  }
  0x34   : > { %1014 = vmatprep.subr.bf16.mxu0 %v1118_v17  ;;  %1045 = vmatprep.subr.bf16.mxu1 %v1118_v17 }
  0x37   : > { %1015 = vmatpush3.bf16.msra.mxu0 %v1118_v17  ;;  %1053 = vmatpush3.bf16.msra.mxu1 %v1118_v17 }
  0x38   : > { %1016 = vmatprep.subr.bf16.mxu0 %v1119_v18  ;;  %1046 = vmatprep.subr.bf16.mxu1 %v1119_v18 }
  0x3b   : > { %1017 = vmatpush3.bf16.msra.mxu0 %v1119_v18  ;;  %1054 = vmatpush3.bf16.msra.mxu1 %v1119_v18 }
  0x3c   : > { %1018 = vmatprep.subr.bf16.mxu0 %v1120_v19  ;;  %1047 = vmatprep.subr.bf16.mxu1 %v1120_v19 }
  0x3f   : > { %1019 = vmatpush3.bf16.msra.mxu0 %v1120_v19  ;;  %1055 = vmatpush3.bf16.msra.mxu1 %v1120_v19 }
  0x40   : > { %1020 = vmatprep.subr.bf16.mxu0 %v1121_v22  ;;  %1048 = vmatprep.subr.bf16.mxu1 %v1121_v22 }
  0x43   : > { %1021 = vmatpush3.bf16.msra.mxu0 %v1121_v22  ;;  %1056 = vmatpush3.bf16.msra.mxu1 %v1121_v22 }
  0x44   : > { %1022 = vmatprep.subr.bf16.mxu0 %v1122_v23  ;;  %1049 = vmatprep.subr.bf16.mxu1 %v1122_v23 }
  0x47   : > { %1023 = vmatpush3.bf16.msra.mxu0 %v1122_v23  ;;  %1057 = vmatpush3.bf16.msra.mxu1 %v1122_v23 }
  0x48   : > { %1024 = vmatprep.subr.bf16.mxu0 %v1123_v24  ;;  %1050 = vmatprep.subr.bf16.mxu1 %v1123_v24 }
  0x4b   : > { %1025 = vmatpush3.bf16.msra.mxu0 %v1123_v24  ;;  %1058 = vmatpush3.bf16.msra.mxu1 %v1123_v24 }
  0x4c   : > { %1026 = vmatprep.subr.bf16.mxu0 %v1124_v25  ;;  %1051 = vmatprep.subr.bf16.mxu1 %v1124_v25 }
  0x4f   : > { %1027 = vmatpush3.bf16.msra.mxu0 %v1124_v25  ;;  %1059 = vmatpush3.bf16.msra.mxu1 %v1124_v25 }
  0x52   : > { %1029 = vmatmul.mubr.bf16.vlgmr.msra.gmra.mrb[0].mxu0 %v1127_v26  ;;  %1037 = vmatmul.mubr.bf16.vlgmr.msra.gmra.mrb[0].mxu1 %v1128_v27 }
  0x53   : > { %1032 = vmatprep.mubr.bf16.mxu0 %v1129_v28  ;;  %1040 = vmatprep.mubr.bf16.mxu1 %v1130_v29 }
  0x5a   : > { %1033 = vmatmul.mubr.bf16.gmra.mrb[4].mxu0 %v1131_v30  ;;  %1041 = vmatmul.mubr.bf16.gmra.mrb[4].mxu1 %v1132_v31 }
 0x125   : > { %v1030_v32 = vpop.f32.mrb[0].mxu0  ;;  %v1323_v33 = vpop.f32.mrb[0].mxu1 }
 0x126   : > { %v477_v34 = vpop.f32.mrb[1].mxu0  ;;  %v509_v35 = vpop.f32.mrb[1].mxu1  ;;  %547 = vst [vmem:[%s544_s30 + $0x10] sm:$0xff] (!%p911_p12), %v1030_v32  ;;  %555 = vst [vmem:[%s544_s30 + $0x50] sm:$0xff] (!%p911_p12), %v1323_v33 }
 0x127   : > { %v1031_v36 = vpop.f32.mrb[2].mxu0  ;;  %v1325_v37 = vpop.f32.mrb[2].mxu1  ;;  %545 = vst [vmem:[%s544_s30] sm:$0xff] (!%p911_p12), %v477_v34  ;;  %553 = vst [vmem:[%s544_s30 + $0x40] sm:$0xff] (!%p911_p12), %v509_v35 }
 0x128   : > { %v480_v38 = vpop.f32.mrb[3].mxu0  ;;  %v512_v39 = vpop.f32.mrb[3].mxu1  ;;  %548 = vst [vmem:[%s544_s30 + $0x18] sm:$0xff] (!%p911_p12), %v1031_v36  ;;  %556 = vst [vmem:[%s544_s30 + $0x58] sm:$0xff] (!%p911_p12), %v1325_v37 }
 0x129   : > { %546 = vst [vmem:[%s544_s30 + $0x8] sm:$0xff] (!%p911_p12), %v480_v38  ;;  %554 = vst [vmem:[%s544_s30 + $0x48] sm:$0xff] (!%p911_p12), %v512_v39 }
 0x12a   : > { %543 = sbr.rel (%p911_p12) target bundleno = 306 (0x132), region = 77 }
 0x12d   : > { %v1034_v40 = vpop.f32.mrb[4].mxu0  ;;  %v1327_v41 = vpop.f32.mrb[4].mxu1 }
 0x12e   : > { %v493_v42 = vpop.f32.mrb[5].mxu0  ;;  %v1329_v43 = vpop.f32.mrb[5].mxu1  ;;  %551 = vst [vmem:[%s544_s30 + $0x30] sm:$0xff] (!%p911_p12), %v1034_v40  ;;  %559 = vst [vmem:[%s544_s30 + $0x70] sm:$0xff] (!%p911_p12), %v1327_v41 }
 0x12f   : > { %v1035_v44 = vpop.f32.mrb[6].mxu0  ;;  %v1331_v45 = vpop.f32.mrb[6].mxu1  ;;  %549 = vst [vmem:[%s544_s30 + $0x20] sm:$0xff] (!%p911_p12), %v493_v42  ;;  %557 = vst [vmem:[%s544_s30 + $0x60] sm:$0xff] (!%p911_p12), %v1329_v43 }
 0x130   : > { %v496_v46 = vpop.f32.mrb[7].mxu0  ;;  %v528_v47 = vpop.f32.mrb[7].mxu1  ;;  %552 = vst [vmem:[%s544_s30 + $0x38] sm:$0xff] (!%p911_p12), %v1035_v44  ;;  %560 = vst [vmem:[%s544_s30 + $0x78] sm:$0xff] (!%p911_p12), %v1331_v45 }
 0x131   : > { %550 = vst [vmem:[%s544_s30 + $0x28] sm:$0xff] %v496_v46  ;;  %558 = vst [vmem:[%s544_s30 + $0x68] sm:$0xff] %v528_v47 }
 0x132 PF: > { %p912_p13 = scmp.le.s32.totalorder %s1175_s15, 0 }
 0x133   : > { %s1342_s4 = scalar_lea.vmem (!%p912_p13), [#allocation2], %s1292_s10 }
 0x134   : > { %564 = sbr.rel (%p912_p13) target bundleno = 323 (0x143), region = 81 }
 0x138   : > { %v566_v48 = vld [vmem:[%s1342_s4] sm:$0xff] (!%p912_p13)  ;;  %v567_v49 = vld [vmem:[%s1342_s4 + $0x8] sm:$0xff] (!%p912_p13)  ;;  %v568_v50 = vld [vmem:[%s1342_s4 + $0x10] sm:$0xff] (!%p912_p13) }
 0x139   : > { %v582_v51 = vadd.f32 (!%p912_p13), %v566_v48, %v477_v34  ;;  %v583_v52 = vadd.f32 (!%p912_p13), %v567_v49, %v480_v38  ;;  %v584_v53 = vadd.f32 (!%p912_p13), %v1030_v32, %v568_v50  ;;  %v569_v54 = vld [vmem:[%s1342_s4 + $0x18] sm:$0xff] (!%p912_p13)  ;;  %v570_v55 = vld [vmem:[%s1342_s4 + $0x20] sm:$0xff] (!%p912_p13)  ;;  %v571_v56 = vld [vmem:[%s1342_s4 + $0x28] sm:$0xff] (!%p912_p13) }
 0x13a   : > { %v585_v57 = vadd.f32 (!%p912_p13), %v1031_v36, %v569_v54  ;;  %v586_v58 = vadd.f32 (!%p912_p13), %v570_v55, %v493_v42  ;;  %v587_v59 = vadd.f32 (!%p912_p13), %v571_v56, %v496_v46  ;;  %v572_v60 = vld [vmem:[%s1342_s4 + $0x30] sm:$0xff] (!%p912_p13)  ;;  %v573_v61 = vld [vmem:[%s1342_s4 + $0x38] sm:$0xff] (!%p912_p13)  ;;  %v574_v62 = vld [vmem:[%s1342_s4 + $0x40] sm:$0xff] (!%p912_p13) }
 0x13b   : > { %598 = vst [vmem:[%s1342_s4] sm:$0xff] %v582_v51  ;;  %599 = vst [vmem:[%s1342_s4 + $0x8] sm:$0xff] %v583_v52  ;;  %v588_v63 = vadd.f32 %v1034_v40, %v572_v60  ;;  %v589_v0 = vadd.f32 %v1035_v44, %v573_v61  ;;  %v590_v1 = vadd.f32 %v574_v62, %v509_v35  ;;  %v575_v2 = vld [vmem:[%s1342_s4 + $0x48] sm:$0xff]  ;;  %v576_v3 = vld [vmem:[%s1342_s4 + $0x50] sm:$0xff] }
 0x13c   : > { %600 = vst [vmem:[%s1342_s4 + $0x10] sm:$0xff] %v584_v53  ;;  %v577_v4 = vld [vmem:[%s1342_s4 + $0x58] sm:$0xff]  ;;  %601 = vst [vmem:[%s1342_s4 + $0x18] sm:$0xff] %v585_v57  ;;  %v591_v5 = vadd.f32 %v575_v2, %v512_v39  ;;  %v592_v6 = vadd.f32 %v1323_v33, %v576_v3  ;;  %v578_v8 = vld [vmem:[%s1342_s4 + $0x60] sm:$0xff] }
 0x13d   : > { %602 = vst [vmem:[%s1342_s4 + $0x20] sm:$0xff] %v586_v58  ;;  %603 = vst [vmem:[%s1342_s4 + $0x28] sm:$0xff] %v587_v59  ;;  %v593_v7 = vadd.f32 %v1325_v37, %v577_v4  ;;  %v579_v9 = vld [vmem:[%s1342_s4 + $0x68] sm:$0xff]  ;;  %v580_v10 = vld [vmem:[%s1342_s4 + $0x70] sm:$0xff]  ;;  %v594_v11 = vadd.f32 %v578_v8, %v1329_v43 }
 0x13e   : > { %604 = vst [vmem:[%s1342_s4 + $0x30] sm:$0xff] %v588_v63  ;;  %605 = vst [vmem:[%s1342_s4 + $0x38] sm:$0xff] %v589_v0  ;;  %v595_v12 = vadd.f32 %v579_v9, %v528_v47  ;;  %v596_v13 = vadd.f32 %v1327_v41, %v580_v10  ;;  %v581_v14 = vld [vmem:[%s1342_s4 + $0x78] sm:$0xff] }
 0x13f   : > { %606 = vst [vmem:[%s1342_s4 + $0x40] sm:$0xff] %v590_v1  ;;  %607 = vst [vmem:[%s1342_s4 + $0x48] sm:$0xff] %v591_v5  ;;  %v597_v15 = vadd.f32 %v1331_v45, %v581_v14 }
 0x140   : > { %608 = vst [vmem:[%s1342_s4 + $0x50] sm:$0xff] %v592_v6  ;;  %609 = vst [vmem:[%s1342_s4 + $0x58] sm:$0xff] %v593_v7 }
 0x141   : > { %610 = vst [vmem:[%s1342_s4 + $0x60] sm:$0xff] %v594_v11  ;;  %611 = vst [vmem:[%s1342_s4 + $0x68] sm:$0xff] %v595_v12 }
 0x142   : > { %612 = vst [vmem:[%s1342_s4 + $0x70] sm:$0xff] %v596_v13  ;;  %613 = vst [vmem:[%s1342_s4 + $0x78] sm:$0xff] %v597_v15 }
 0x143 PF: > { %p913_p0 = scmp.ne.s32.totalorder %s1175_s15, 2 }
 0x144   : > { %v1385_v16 = vld [vmem:[%s1454_s2] ss:$0 sm:$0xff] (!%p913_p0)  ;;  %s1388_s7 = scalar_lea.vmem (!%p913_p0), [#allocation2], %s1292_s10 }
 0x145   : > { %617 = sbr.rel (%p913_p0) target bundleno = 353 (0x161), region = 85 }
 0x149   : > { %v619_v17 = vld [vmem:[%s1388_s7] sm:$0xff] (!%p913_p0)  ;;  %v620_v18 = vld [vmem:[%s1388_s7 + $0x8] sm:$0xff] (!%p913_p0)  ;;  %v621_v19 = vld [vmem:[%s1388_s7 + $0x10] sm:$0xff] (!%p913_p0) }
 0x14a   : > { %v642_v20 = vadd.f32 (!%p913_p0), %v1385_v16, %v619_v17  ;;  %v643_v21 = vadd.f32 (!%p913_p0), %v1385_v16, %v620_v18  ;;  %v622_v22 = vld [vmem:[%s1388_s7 + $0x18] sm:$0xff] (!%p913_p0)  ;;  %v644_v23 = vadd.f32 (!%p913_p0), %v1385_v16, %v621_v19  ;;  %v623_v24 = vld [vmem:[%s1388_s7 + $0x20] sm:$0xff] (!%p913_p0)  ;;  %v624_v25 = vld [vmem:[%s1388_s7 + $0x28] sm:$0xff] (!%p913_p0) }
 0x14b   : > { %v645_v26 = vadd.f32 (!%p913_p0), %v1385_v16, %v622_v22  ;;  %v646_v27 = vadd.f32 (!%p913_p0), %v1385_v16, %v623_v24  ;;  %v647_v28 = vadd.f32 (!%p913_p0), %v1385_v16, %v624_v25  ;;  %v625_v29 = vld [vmem:[%s1388_s7 + $0x30] sm:$0xff] (!%p913_p0)  ;;  %v626_v30 = vld [vmem:[%s1388_s7 + $0x38] sm:$0xff] (!%p913_p0)  ;;  %v627_v37 = vld [vmem:[%s1388_s7 + $0x40] sm:$0xff] (!%p913_p0) }
 0x14c   : > { %vm658_vm0 = vcmp.gt.f32.partialorder %v642_v20, 0.0  ;;  %vm659_vm1 = vcmp.gt.f32.partialorder %v643_v21, 0.0  ;;  %v674_v31 = vmul.f32 0.01, %v642_v20  ;;  %v675_v32 = vmul.f32 0.01, %v643_v21 }
 0x14d   : > { %vm660_vm2 = vcmp.gt.f32.partialorder %v644_v23, 0.0  ;;  %vm661_vm3 = vcmp.gt.f32.partialorder %v645_v26, 0.0  ;;  %v676_v33 = vmul.f32 0.01, %v644_v23  ;;  %v677_v34 = vmul.f32 0.01, %v645_v26 }
 0x14e   : > { %v690_v35 = vsel %vm658_vm0, %v642_v20, %v674_v31  ;;  %v691_v36 = vsel %vm659_vm1, %v643_v21, %v675_v32  ;;  %vm662_vm4 = vcmp.gt.f32.partialorder %v646_v27, 0.0  ;;  %vm663_vm5 = vcmp.gt.f32.partialorder %v647_v28, 0.0  ;;  %v628_v38 = vld [vmem:[%s1388_s7 + $0x48] sm:$0xff]  ;;  %v629_v39 = vld [vmem:[%s1388_s7 + $0x50] sm:$0xff]  ;;  %v630_v51 = vld [vmem:[%s1388_s7 + $0x58] sm:$0xff] }
 0x14f   : > { %v952_v40 = vpack.c.bf16 %v691_v36, %v690_v35  ;;  %v692_v41 = vsel %vm660_vm2, %v644_v23, %v676_v33  ;;  %v693_v42 = vsel %vm661_vm3, %v645_v26, %v677_v34  ;;  %v678_v43 = vmul.f32 0.01, %v646_v27  ;;  %v631_v55 = vld [vmem:[%s1388_s7 + $0x60] sm:$0xff]  ;;  %v632_v62 = vld [vmem:[%s1388_s7 + $0x68] sm:$0xff]  ;;  %v633_v2 = vld [vmem:[%s1388_s7 + $0x70] sm:$0xff] }
 0x150   : > { %v957_v44 = vpack.c.bf16 %v693_v42, %v692_v41  ;;  %v679_v45 = vmul.f32 0.01, %v647_v28  ;;  %v648_v46 = vadd.f32 %v1385_v16, %v625_v29  ;;  %v649_v47 = vadd.f32 %v1385_v16, %v626_v30  ;;  %v634_v3 = vld [vmem:[%s1388_s7 + $0x78] sm:$0xff] }
 0x151   : > { %953 = vst [vmem:[%s1303_s29] sm:$0xff] %v952_v40   ;;  %v694_v48 = vsel %vm662_vm4, %v646_v27, %v678_v43  ;;  %v650_v49 = vadd.f32 %v1385_v16, %v627_v37  ;;  %v651_v50 = vadd.f32 %v1385_v16, %v628_v38  ;;  %v652_v52 = vadd.f32 %v1385_v16, %v629_v39 }
 0x152   : > { %989 = vst [vmem:[%s1303_s29 + $0x8] sm:$0xff] %v957_v44   ;;  %v695_v53 = vsel %vm663_vm5, %v647_v28, %v679_v45  ;;  %vm664_vm6 = vcmp.gt.f32.partialorder %v648_v46, 0.0  ;;  %vm665_vm7 = vcmp.gt.f32.partialorder %v649_v47, 0.0  ;;  %v680_v54 = vmul.f32 0.01, %v648_v46 }
 0x153   : > { %v962_v56 = vpack.c.bf16 %v695_v53, %v694_v48  ;;  %v681_v57 = vmul.f32 0.01, %v649_v47  ;;  %vm666_vm8 = vcmp.gt.f32.partialorder %v650_v49, 0.0  ;;  %vm667_vm9 = vcmp.gt.f32.partialorder %v651_v50, 0.0 }
 0x154   : > { %v696_v58 = vsel %vm664_vm6, %v648_v46, %v680_v54  ;;  %v682_v59 = vmul.f32 0.01, %v650_v49  ;;  %v683_v60 = vmul.f32 0.01, %v651_v50  ;;  %v653_v61 = vadd.f32 %v1385_v16, %v630_v51 }
 0x155   : > { %990 = vst [vmem:[%s1303_s29 + $0x10] sm:$0xff] %v962_v56   ;;  %v697_v63 = vsel %vm665_vm7, %v649_v47, %v681_v57  ;;  %vm668_vm10 = vcmp.gt.f32.partialorder %v652_v52, 0.0  ;;  %v684_v0 = vmul.f32 0.01, %v652_v52  ;;  %v654_v1 = vadd.f32 %v1385_v16, %v631_v55 }
 0x156   : > { %v967_v4 = vpack.c.bf16 %v697_v63, %v696_v58  ;;  %v698_v5 = vsel %vm666_vm8, %v650_v49, %v682_v59  ;;  %v699_v6 = vsel %vm667_vm9, %v651_v50, %v683_v60  ;;  %vm669_vm11 = vcmp.gt.f32.partialorder %v653_v61, 0.0 }
 0x157   : > { %v972_v7 = vpack.c.bf16 %v699_v6, %v698_v5  ;;  %v685_v8 = vmul.f32 0.01, %v653_v61  ;;  %v700_v9 = vsel %vm668_vm10, %v652_v52, %v684_v0  ;;  %v655_v10 = vadd.f32 %v1385_v16, %v632_v62 }
 0x158   : > { %991 = vst [vmem:[%s1303_s29 + $0x18] sm:$0xff] %v967_v4   ;;  %vm670_vm12 = vcmp.gt.f32.partialorder %v654_v1, 0.0  ;;  %v686_v11 = vmul.f32 0.01, %v654_v1  ;;  %v656_v12 = vadd.f32 %v1385_v16, %v633_v2  ;;  %v657_v13 = vadd.f32 %v1385_v16, %v634_v3 }
 0x159   : > { %992 = vst [vmem:[%s1303_s29 + $0x20] sm:$0xff] %v972_v7   ;;  %v701_v14 = vsel %vm669_vm11, %v653_v61, %v685_v8  ;;  %vm671_vm13 = vcmp.gt.f32.partialorder %v655_v10, 0.0  ;;  %v687_v15 = vmul.f32 0.01, %v655_v10 }
 0x15a   : > { %v977_v17 = vpack.c.bf16 %v701_v14, %v700_v9  ;;  %v702_v18 = vsel %vm670_vm12, %v654_v1, %v686_v11  ;;  %vm672_vm14 = vcmp.gt.f32.partialorder %v656_v12, 0.0  ;;  %vm673_vm15 = vcmp.gt.f32.partialorder %v657_v13, 0.0 }
 0x15b   : > { %v703_v19 = vsel %vm671_vm13, %v655_v10, %v687_v15  ;;  %v688_v20 = vmul.f32 0.01, %v656_v12  ;;  %v689_v21 = vmul.f32 0.01, %v657_v13 }
 0x15c   : > { %993 = vst [vmem:[%s1303_s29 + $0x28] sm:$0xff] %v977_v17   ;;  %v982_v22 = vpack.c.bf16 %v703_v19, %v702_v18 }
 0x15d   : > { %v704_v23 = vsel %vm672_vm14, %v656_v12, %v688_v20  ;;  %v705_v24 = vsel %vm673_vm15, %v657_v13, %v689_v21 }
 0x15e   : > { %994 = vst [vmem:[%s1303_s29 + $0x30] sm:$0xff] %v982_v22   ;;  %v987_v25 = vpack.c.bf16 %v705_v24, %v704_v23 }
 0x160   : > { %995 = vst [vmem:[%s1303_s29 + $0x38] sm:$0xff] %v987_v25  }
 0x161 PF: > { %s13_s18 = sadd.s32 1, %s1187_s18   ;;  %s1456_s12 = smov %s1167_s13 }
 0x162   : > { %p10_p1 = scmp.ge.s32.totalorder %s13_s18, 8   ;;  %s1457_s13 = smov %s1260_s25 }
 0x163   : > { %s1458_s14 = smov %s1179_s16  ;;  %s1459_s15 = smov %s1183_s17 }
 0x164   : > { %s1460_s16 = smov %s1463_s19  ;;  %s1461_s17 = smov %s1467_s20 }
 0x165   :  { %12 = sbr.rel (!%p10_p1) target bundleno = 4 (0x4), region = 126 }

// kernel: vposert_forward.4
= control target key start
LH: loop header
LB: loop body
LE: loop exit
PB: predicated region body
PF: predicated region fallthrough
CT: control target
= control target key end

     0   :  { %s2410_s17 = smov 0   ;;  %s3114_s0 = inlined_call_operand.vmem [shape: bf16[256,128], index: 0, kind: input, shape index: {}]   ;;  %s3115_s1 = inlined_call_operand.vmem [shape: f32[256,128], index: 1, kind: input, shape index: {}]   ;;  %s3116_s2 = inlined_call_operand.vmem [shape: bf16[128,128], index: 2, kind: input, shape index: {}]   ;;  %s3117_s3 = inlined_call_operand.vmem [shape: f32[1,128], index: 3, kind: input, shape index: {}]   ;;  %s3118_s4 = inlined_call_operand.vmem [shape: bf16[128,256], index: 4, kind: input, shape index: {}]   ;;  %s3119_s5 = inlined_call_operand.vmem [shape: f32[1,256], index: 5, kind: input, shape index: {}]   ;;  %s3120_s6 = inlined_call_operand.vmem [shape: bf16[128,128], index: 6, kind: input, shape index: {}]   ;;  %s3121_s7 = inlined_call_operand.vmem [shape: f32[1,128], index: 7, kind: input, shape index: {}]   ;;  %s3122_s8 = inlined_call_operand.vmem [shape: bf16[128,128], index: 8, kind: input, shape index: {}]   ;;  %s3123_s9 = inlined_call_operand.vmem [shape: f32[1,128], index: 9, kind: input, shape index: {}]   ;;  %s3124_s10 = inlined_call_operand.vmem [shape: bf16[256,128], index: 10, kind: output, shape index: {0}]   ;;  %s3125_s11 = inlined_call_operand.vmem [shape: f32[256,384], index: 11, kind: output, shape index: {1}]  }
   0x1 LB: > { %s1906_s18 = sadd.s32 4294967295, %s2347_s17   ;;  %p1910_p0 = scmp.ge.s32.totalorder %s2347_s17, 1  ;;  %s2347_s17 = sphi %s2410_s17, %s22_s17  }
   0x2   : > { %p352_p1 = scmp.lt.s32.totalorder %s2347_s17, 3 }
   0x4   : > { %p353_p2 = pnand %p1910_p0, %p352_p1 }
   0x5   : > { %v2221_v0 = vld [vmem:[%s3116_s2] sm:$0xff] (!%p353_p2)   ;;  %s1911_s21 = sshll.u32 (!%p353_p2), %s1906_s18, 4  ;;  %v2222_v1 = vld [vmem:[%s3116_s2 + $0x8] sm:$0xff] (!%p353_p2)   ;;  %v2223_v2 = vld [vmem:[%s3116_s2 + $0x10] sm:$0xff] (!%p353_p2)   ;;  %v2349_v32 = vmov (!%p353_p2), 0  }
   0x6   : > { %356 = sbr.rel (%p353_p2) target bundleno = 1029 (0x405), region = 60  ;;  %p404_p3 = scmp.lt.s32.totalorder (!%p353_p2), %s1911_s21, 31  ;;  %2099 = vmatprep.subr.bf16.mxu0 (!%p353_p2), %v2221_v0  ;;  %v2224_v3 = vld [vmem:[%s3116_s2 + $0x18] sm:$0xff] (!%p353_p2)   ;;  %v2225_v5 = vld [vmem:[%s3116_s2 + $0x20] sm:$0xff] (!%p353_p2)   ;;  %v2226_v6 = vld [vmem:[%s3116_s2 + $0x28] sm:$0xff] (!%p353_p2)   ;;  %809 = vmatprep.mubr.bf16.mxu1 (!%p353_p2), %v2349_v32 }
   0x7   : > { %2100 = vmatpush3.bf16.msra.mxu0 (!%p353_p2), %v2221_v0  ;;  %v2237_v7 = vld [vmem:[%s3118_s4 + $0x4] ss:$8 sps:$4 sm:$0xff] (!%p353_p2)   ;;  %v2239_v8 = vld [vmem:[%s3118_s4] ss:$8 sps:$4 sm:$0xff] (!%p353_p2)   ;;  %v2240_v9 = vld [vmem:[%s3118_s4 + $0x14] ss:$8 sps:$4 sm:$0xff] (!%p353_p2)  }
   0x8   : > { %2101 = vmatprep.subr.bf16.mxu0 (!%p353_p2), %v2222_v1  ;;  %777 = vmatprep.subr.bf16.mxu1 (!%p353_p2), %v2237_v7  ;;  %v2227_v10 = vld [vmem:[%s3116_s2 + $0x30] sm:$0xff] (!%p353_p2)   ;;  %v2243_v12 = vld [vmem:[%s3118_s4 + $0x24] ss:$8 sps:$4 sm:$0xff] (!%p353_p2)   ;;  %v2228_v13 = vld [vmem:[%s3116_s2 + $0x38] sm:$0xff] (!%p353_p2)  }
   0x9   : > { %778 = vmatpush1.bf16.msra.mxu1 (!%p353_p2), %v2239_v8  ;;  %v2242_v11 = vld [vmem:[%s3118_s4 + $0x10] ss:$8 sps:$4 sm:$0xff] (!%p353_p2)   ;;  %v2245_v14 = vld [vmem:[%s3118_s4 + $0x20] ss:$8 sps:$4 sm:$0xff] (!%p353_p2)   ;;  %v2246_v15 = vld [vmem:[%s3118_s4 + $0x34] ss:$8 sps:$4 sm:$0xff] (!%p353_p2)  }
   0xa   : > { %779 = vmatprep.subr.bf16.mxu1 (!%p353_p2), %v2240_v9  ;;  %v2248_v16 = vld [vmem:[%s3118_s4 + $0x30] ss:$8 sps:$4 sm:$0xff] (!%p353_p2)   ;;  %v2249_v17 = vld [vmem:[%s3118_s4 + $0x44] ss:$8 sps:$4 sm:$0xff] (!%p353_p2)   ;;  %v2251_v20 = vld [vmem:[%s3118_s4 + $0x40] ss:$8 sps:$4 sm:$0xff] (!%p353_p2)  }
   0xb   : > { %2102 = vmatpush3.bf16.msra.mxu0 (!%p353_p2), %v2222_v1  ;;  %v2252_v21 = vld [vmem:[%s3118_s4 + $0x54] ss:$8 sps:$4 sm:$0xff] (!%p353_p2)   ;;  %v2254_v22 = vld [vmem:[%s3118_s4 + $0x50] ss:$8 sps:$4 sm:$0xff] (!%p353_p2)   ;;  %v2255_v28 = vld [vmem:[%s3118_s4 + $0x64] ss:$8 sps:$4 sm:$0xff] (!%p353_p2)  }
   0xc   : > { %2103 = vmatprep.subr.bf16.mxu0 (!%p353_p2), %v2223_v2  ;;  %v2257_v29 = vld [vmem:[%s3118_s4 + $0x60] ss:$8 sps:$4 sm:$0xff] (!%p353_p2)   ;;  %v2258_v30 = vld [vmem:[%s3118_s4 + $0x74] ss:$8 sps:$4 sm:$0xff] (!%p353_p2)   ;;  %v2260_v31 = vld [vmem:[%s3118_s4 + $0x70] ss:$8 sps:$4 sm:$0xff] (!%p353_p2)  }
   0xd   : > { %s3139_s21 = smov (!%p404_p3, %s1911_s21), 31  ;;  %780 = vmatpush1.bf16.msra.mxu1 %v2242_v11  ;;  %v1919_v34 = vld [vmem:[%s3117_s3] ss:$0 sm:$0xff]  ;;  %v2262_v11 = vld [vmem:[%s3120_s6 + $0x8] sm:$0xff]  }
   0xe   : > { %s1912_s26 = sshll.u32 %s3139_s21, 2  ;;  %781 = vmatprep.subr.bf16.mxu1 %v2243_v12  ;;  %v2263_v12 = vld [vmem:[%s3120_s6 + $0x10] sm:$0xff]   ;;  %s2211_s18 = smul.u32 24, %s3139_s21 }
   0xf   : > { %s2435_s29 = scalar_lea.vmem %s3114_s0, %s1912_s26  ;;  %2104 = vmatpush3.bf16.msra.mxu0 %v2223_v2  ;;  %s1914_s27 = sshll.u32 %s3139_s21, 3 }
  0x10   : > { %v2229_v4 = vld [vmem:[%s2435_s29] sm:$0xff]   ;;  %2105 = vmatprep.subr.bf16.mxu0 %v2224_v3  ;;  %v2230_v18 = vld [vmem:[%s2435_s29 + $0x8] sm:$0xff]   ;;  %v2231_v19 = vld [vmem:[%s2435_s29 + $0x10] sm:$0xff]   ;;  %s2572_s24 = scalar_lea.vmem %s3125_s11, %s2211_s18  ;;  %s2738_s12 = scalar_lea.vmem %s3115_s1, %s1914_s27 }
  0x11   : > { %2115 = vmatprep.mubr.bf16.mxu0 %v2229_v4  ;;  %782 = vmatpush1.bf16.msra.mxu1 %v2245_v14  ;;  %v2232_v23 = vld [vmem:[%s2435_s29 + $0x18] sm:$0xff]   ;;  %v2233_v24 = vld [vmem:[%s2435_s29 + $0x20] sm:$0xff]   ;;  %v2234_v25 = vld [vmem:[%s2435_s29 + $0x28] sm:$0xff]   ;;  %s3089_s27 = scalar_lea.vmem %s3124_s10, %s1912_s26 }
  0x12   : > { %783 = vmatprep.subr.bf16.mxu1 %v2246_v15  ;;  %v2235_v26 = vld [vmem:[%s2435_s29 + $0x30] sm:$0xff]   ;;  %v2236_v27 = vld [vmem:[%s2435_s29 + $0x38] sm:$0xff]   ;;  %v2265_v14 = vld [vmem:[%s3120_s6 + $0x20] sm:$0xff]  }
  0x13   : > { %2106 = vmatpush3.bf16.msra.mxu0 %v2224_v3  ;;  %v2266_v15 = vld [vmem:[%s3120_s6 + $0x28] sm:$0xff]  }
  0x14   : > { %2107 = vmatprep.subr.bf16.mxu0 %v2225_v5 }
  0x15   : > { %784 = vmatpush1.bf16.msra.mxu1 %v2248_v16  ;;  %v2267_v16 = vld [vmem:[%s3120_s6 + $0x30] sm:$0xff]  }
  0x16   : > { %785 = vmatprep.subr.bf16.mxu1 %v2249_v17  ;;  %v2268_v17 = vld [vmem:[%s3120_s6 + $0x38] sm:$0xff]  }
  0x17   : > { %2108 = vmatpush3.bf16.msra.mxu0 %v2225_v5 }
  0x18   : > { %2109 = vmatprep.subr.bf16.mxu0 %v2226_v6 }
  0x19   : > { %786 = vmatpush1.bf16.msra.mxu1 %v2251_v20  ;;  %v2538_v20 = vld [vmem:[%s3122_s8] sm:$0xff]  }
  0x1a   : > { %787 = vmatprep.subr.bf16.mxu1 %v2252_v21  ;;  %v2544_v21 = vld [vmem:[%s3122_s8 + $0x8] sm:$0xff]  }
  0x1b   : > { %2110 = vmatpush3.bf16.msra.mxu0 %v2226_v6 }
  0x1c   : > { %2111 = vmatprep.subr.bf16.mxu0 %v2227_v10 }
  0x1d   : > { %788 = vmatpush1.bf16.msra.mxu1 %v2254_v22 }
  0x1e   : > { %789 = vmatprep.subr.bf16.mxu1 %v2255_v28  ;;  %v2567_v28 = vld [vmem:[%s3122_s8 + $0x18] sm:$0xff]  }
  0x1f   : > { %2112 = vmatpush3.bf16.msra.mxu0 %v2227_v10  ;;  %v2261_v10 = vld [vmem:[%s3120_s6] sm:$0xff]  }
  0x20   : > { %2113 = vmatprep.subr.bf16.mxu0 %v2228_v13 }
  0x21   : > { %790 = vmatpush1.bf16.msra.mxu1 %v2257_v29 }
  0x22   : > { %791 = vmatprep.subr.bf16.mxu1 %v2258_v30 }
  0x23   : > { %2114 = vmatpush3.bf16.msra.mxu0 %v2228_v13  ;;  %v2264_v13 = vld [vmem:[%s3120_s6 + $0x18] sm:$0xff]  }
  0x24   : > { %2131 = vmatprep.subr.bf16.mxu0 %v2261_v10 }
  0x25   : > { %792 = vmatpush1.bf16.msra.mxu1 %v2260_v31 }
  0x26   : > { %2116 = vmatmul.mubr.bf16.vlgmr.msra.gmra.mrb[0].mxu0 %v2230_v18  ;;  %v687_v18 = vlaneseq  ;;  %2195 = vmatprep.subr.bf16.mxu1 %v2538_v20 }
  0x27   : > { %2119 = vmatprep.mubr.bf16.mxu0 %v2231_v19  ;;  %2132 = vmatpush3.bf16.msra.mxu0 %v2261_v10 }
  0x28   : > { %2133 = vmatprep.subr.bf16.mxu0 %v2262_v11  ;;  %v688_v19 = vshrl.u32 %v687_v18, 7 }
  0x2a   : > { %v689_v22 = vsub.s32 0, %v688_v19 }
  0x2b   : > { %2134 = vmatpush3.bf16.msra.mxu0 %v2262_v11 }
  0x2c   : > { %2135 = vmatprep.subr.bf16.mxu0 %v2263_v12 }
  0x2e   : > { %2120 = vmatmul.mubr.bf16.gmra.mrb[4].mxu0 %v2232_v23  ;;  %v685_v23 = vld [vmem:[%s3119_s5] sm:$0x3] }
  0x2f   : > { %2123 = vmatprep.mubr.bf16.mxu0 %v2233_v24  ;;  %2136 = vmatpush3.bf16.msra.mxu0 %v2263_v12  ;;  %v693_v24 = vsub.s32 1, %v688_v19 }
  0x30   : > { %2137 = vmatprep.subr.bf16.mxu0 %v2264_v13 }
  0x33   : > { %2138 = vmatpush3.bf16.msra.mxu0 %v2264_v13 }
  0x34   : > { %2139 = vmatprep.subr.bf16.mxu0 %v2265_v14 }
  0x36   : > { %2124 = vmatmul.mubr.bf16.gmra.mrb[8].mxu0 %v2234_v25  ;;  %v2555_v25 = vld [vmem:[%s3122_s8 + $0x10] sm:$0xff]  }
  0x37   : > { %2127 = vmatprep.mubr.bf16.mxu0 %v2235_v26  ;;  %2140 = vmatpush3.bf16.msra.mxu0 %v2265_v14  ;;  %v2559_v26 = vrot.slane %v685_v23, %v689_v22 }
  0x38   : > { %2141 = vmatprep.subr.bf16.mxu0 %v2266_v15 }
  0x3b   : > { %2142 = vmatpush3.bf16.msra.mxu0 %v2266_v15 }
  0x3c   : > { %2143 = vmatprep.subr.bf16.mxu0 %v2267_v16 }
  0x3e   : > { %2128 = vmatmul.mubr.bf16.gmra.mrb[12].mxu0 %v2236_v27  ;;  %v2562_v27 = vrot.slane %v685_v23, %v693_v24 }
  0x3f   : > { %2144 = vmatpush3.bf16.msra.mxu0 %v2267_v16 }
  0x40   : > { %2145 = vmatprep.subr.bf16.mxu0 %v2268_v17 }
  0x43   : > { %2146 = vmatpush3.bf16.msra.mxu0 %v2268_v17 }
  0x44   : > { %2163 = vmatprep.subr.bf16.mxu0 %v2538_v20 }
  0xf9   : > { %v2117_v33 = vpop.f32.mrb[0].mxu0 }
  0xfa   : > { %v598_v35 = vpop.f32.mrb[1].mxu0  ;;  %v607_v37 = vadd.f32 %v2117_v33, %v1919_v34 }
  0xfb   : > { %v2118_v36 = vpop.f32.mrb[2].mxu0  ;;  %v599_v40 = vadd.f32 %v1919_v34, %v598_v35 }
  0xfc   : > { %v610_v38 = vadd.f32 %v2118_v36, %v1919_v34  ;;  %v601_v39 = vpop.f32.mrb[3].mxu0  ;;  %v2590_v36 = vld [vmem:[%s3122_s8 + $0x20] sm:$0xff]  }
  0xfd   : > { %v602_v41 = vadd.f32 %v1919_v34, %v601_v39 }
  0xfe   : > { %v662_v42 = vpack.c.bf16 %v610_v38, %v607_v37 }
  0xff   : > { %v661_v43 = vpack.c.bf16 %v602_v41, %v599_v40 }
 0x101   : > { %810 = vmatmul.mubr.bf16.vlgmr.msra.gmra.mrb[0].mxu1 %v661_v43  ;;  %v2121_v44 = vpop.f32.mrb[4].mxu0 }
 0x102   : > { %v623_v45 = vadd.f32 %v2121_v44, %v1919_v34  ;;  %v614_v46 = vpop.f32.mrb[5].mxu0  ;;  %819 = vmatprep.mubr.bf16.mxu1 %v2349_v32  ;;  %2203 = vmatpush3.bf16.msra.mxu1 %v2538_v20 }
 0x103   : > { %v615_v47 = vadd.f32 %v1919_v34, %v614_v46  ;;  %v2122_v48 = vpop.f32.mrb[6].mxu0  ;;  %2196 = vmatprep.subr.bf16.mxu1 %v2544_v21 }
 0x104   : > { %v626_v49 = vadd.f32 %v2122_v48, %v1919_v34  ;;  %v617_v50 = vpop.f32.mrb[7].mxu0 }
 0x105   : > { %v618_v51 = vadd.f32 %v1919_v34, %v617_v50 }
 0x106   : > { %v664_v52 = vpack.c.bf16 %v626_v49, %v623_v45  ;;  %2204 = vmatpush3.bf16.msra.mxu1 %v2544_v21 }
 0x107   : > { %v663_v53 = vpack.c.bf16 %v618_v51, %v615_v47  ;;  %2197 = vmatprep.subr.bf16.mxu1 %v2555_v25 }
 0x109   : > { %820 = vmatmul.mubr.bf16.gmra.mrb[4].mxu1 %v662_v42  ;;  %v2125_v54 = vpop.f32.mrb[8].mxu0 }
 0x10a   : > { %829 = vmatprep.mubr.bf16.mxu1 %v2349_v32  ;;  %v639_v55 = vadd.f32 %v2125_v54, %v1919_v34  ;;  %v630_v56 = vpop.f32.mrb[9].mxu0  ;;  %2205 = vmatpush3.bf16.msra.mxu1 %v2555_v25 }
 0x10b   : > { %v631_v57 = vadd.f32 %v1919_v34, %v630_v56  ;;  %v2126_v58 = vpop.f32.mrb[10].mxu0  ;;  %2198 = vmatprep.subr.bf16.mxu1 %v2567_v28 }
 0x10c   : > { %v642_v59 = vadd.f32 %v2126_v58, %v1919_v34  ;;  %v633_v60 = vpop.f32.mrb[11].mxu0 }
 0x10d   : > { %v634_v61 = vadd.f32 %v1919_v34, %v633_v60 }
 0x10e   : > { %v666_v62 = vpack.c.bf16 %v642_v59, %v639_v55  ;;  %2206 = vmatpush3.bf16.msra.mxu1 %v2567_v28 }
 0x10f   : > { %v665_v63 = vpack.c.bf16 %v634_v61, %v631_v57  ;;  %2199 = vmatprep.subr.bf16.mxu1 %v2590_v36 }
 0x111   : > { %830 = vmatmul.mubr.bf16.gmra.mrb[8].mxu1 %v663_v53  ;;  %v2129_v0 = vpop.f32.mrb[12].mxu0 }
 0x112   : > { %839 = vmatprep.mubr.bf16.mxu1 %v2349_v32  ;;  %v655_v1 = vadd.f32 %v2129_v0, %v1919_v34  ;;  %v646_v2 = vpop.f32.mrb[13].mxu0  ;;  %2207 = vmatpush3.bf16.msra.mxu1 %v2590_v36 }
 0x113   : > { %v647_v3 = vadd.f32 %v1919_v34, %v646_v2  ;;  %v2130_v4 = vpop.f32.mrb[14].mxu0 }
 0x114   : > { %v658_v5 = vadd.f32 %v2130_v4, %v1919_v34  ;;  %v649_v6 = vpop.f32.mrb[15].mxu0 }
 0x115   : > { %v650_v7 = vadd.f32 %v1919_v34, %v649_v6 }
 0x116   : > { %v668_v8 = vpack.c.bf16 %v658_v5, %v655_v1 }
 0x117   : > { %v667_v9 = vpack.c.bf16 %v650_v7, %v647_v3 }
 0x119   : > { %840 = vmatmul.mubr.bf16.gmra.mrb[12].mxu1 %v664_v52 }
 0x11a   : > { %849 = vmatprep.mubr.bf16.mxu1 %v2349_v32 }
 0x121   : > { %850 = vmatmul.mubr.bf16.gmra.mrb[16].mxu1 %v665_v63 }
 0x122   : > { %859 = vmatprep.mubr.bf16.mxu1 %v2349_v32 }
 0x129   : > { %860 = vmatmul.mubr.bf16.gmra.mrb[20].mxu1 %v666_v62 }
 0x12a   : > { %869 = vmatprep.mubr.bf16.mxu1 %v2349_v32 }
 0x131   : > { %870 = vmatmul.mubr.bf16.gmra.mrb[24].mxu1 %v667_v9 }
 0x132   : > { %879 = vmatprep.mubr.bf16.mxu1 %v2349_v32 }
 0x139   : > { %880 = vmatmul.mubr.bf16.gmra.mrb[28].mxu1 %v668_v8 }
 0x1d4   : > { %v811_v29 = vpop.f32.mrb[0].mxu1 }
 0x1d5   : > { %v2576_v30 = vadd.f32 %v811_v29, %v2559_v26  ;;  %v813_v31 = vpop.f32.mrb[1].mxu1 }
 0x1d6   : > { %v2580_v32 = vadd.f32 %v813_v31, %v2562_v27  ;;  %v815_v33 = vpop.f32.mrb[2].mxu1 }
 0x1d7   : > { %1770 = vst [vmem:[%s2572_s24 + $0x8] sm:$0xff] %v2576_v30  ;;  %v2585_v34 = vadd.f32 %v815_v33, %v2559_v26  ;;  %v817_v35 = vpop.f32.mrb[3].mxu1 }
 0x1d8   : > { %v938_v37 = vand.u32 2147483647, %v2580_v32  ;;  %v2594_v38 = vadd.f32 %v817_v35, %v2562_v27  ;;  %vm906_vm0 = vcmp.ne.f32.partialorder %v2580_v32, %v2580_v32 }
 0x1d9   : > { %1771 = vst [vmem:[%s2572_s24 + $0x20] sm:$0xff] %v2585_v34 }
 0x1da   : > { %v954_v39 = vsub.f32 0.0, %v938_v37  ;;  %v939_v40 = vand.u32 2147483647, %v2594_v38  ;;  %vm907_vm2 = vcmp.ne.f32.partialorder %v2594_v38, %v2594_v38 }
 0x1dc   : > { %v970_v41 = vmul.f32 1.442695, %v954_v39  ;;  %v955_v42 = vsub.f32 0.0, %v939_v40  ;;  %v821_v43 = vpop.f32.mrb[4].mxu1  ;;  %v890_v39 = vmax.f32 %v2580_v32, 0.0 }
 0x1dd   : > { %v2603_v44 = vadd.f32 %v821_v43, %v2559_v26  ;;  %v823_v45 = vpop.f32.mrb[5].mxu1 }
 0x1de   : > { %2277 = vpow2.f32 %v970_v41  ;;  %v972_v46 = vmul.f32 1.442695, %v955_v42  ;;  %v2606_v47 = vadd.f32 %v823_v45, %v2562_v27  ;;  %v825_v48 = vpop.f32.mrb[6].mxu1  ;;  %v891_v42 = vmax.f32 %v2594_v38, 0.0 }
 0x1df   : > { %1772 = vst [vmem:[%s2572_s24 + $0x38] sm:$0xff] %v2603_v44  ;;  %v2611_v49 = vadd.f32 %v825_v48, %v2559_v26  ;;  %v827_v50 = vpop.f32.mrb[7].mxu1 }
 0x1e0   : > { %2279 = vpow2.f32 %v972_v46  ;;  %v940_v51 = vand.u32 2147483647, %v2606_v47  ;;  %v2617_v52 = vadd.f32 %v827_v50, %v2562_v27  ;;  %vm908_vm4 = vcmp.ne.f32.partialorder %v2606_v47, %v2606_v47 }
 0x1e1   : > { %1773 = vst [vmem:[%s2572_s24 + $0x50] sm:$0xff] %v2611_v49 }
 0x1e2   : > { %v956_v53 = vsub.f32 0.0, %v940_v51  ;;  %v941_v54 = vand.u32 2147483647, %v2617_v52  ;;  %v892_v51 = vmax.f32 %v2606_v47, 0.0  ;;  %vm909_vm6 = vcmp.ne.f32.partialorder %v2617_v52, %v2617_v52 }
 0x1e4   : > { %v974_v55 = vmul.f32 1.442695, %v956_v53  ;;  %v831_v56 = vpop.f32.mrb[8].mxu1  ;;  %v957_v57 = vsub.f32 0.0, %v941_v54 }
 0x1e5   : > { %v2621_v58 = vadd.f32 %v831_v56, %v2559_v26  ;;  %v833_v59 = vpop.f32.mrb[9].mxu1 }
 0x1e6   : > { %2281 = vpow2.f32 %v974_v55  ;;  %v2624_v60 = vadd.f32 %v833_v59, %v2562_v27  ;;  %v835_v61 = vpop.f32.mrb[10].mxu1  ;;  %v976_v62 = vmul.f32 1.442695, %v957_v57 }
 0x1e7   : > { %1774 = vst [vmem:[%s2572_s24 + $0x68] sm:$0xff] %v2621_v58  ;;  %v2629_v63 = vadd.f32 %v835_v61, %v2559_v26  ;;  %v837_v0 = vpop.f32.mrb[11].mxu1 }
 0x1e8   : > { %v2278_v1 = vpop.eup %2277  ;;  %v942_v2 = vand.u32 2147483647, %v2624_v60  ;;  %v2633_v3 = vadd.f32 %v837_v0, %v2562_v27  ;;  %2283 = vpow2.f32 %v976_v62  ;;  %vm910_vm8 = vcmp.ne.f32.partialorder %v2624_v60, %v2624_v60 }
 0x1e9   : > { %v1002_v4 = vadd.f32 1.0, %v2278_v1  ;;  %1775 = vst [vmem:[%s2572_s24 + $0x80] sm:$0xff] %v2629_v63  ;;  %v1005_v12 = vmul.f32 -0.5, %v2278_v1  ;;  %v1008_v22 = vand.u32 2147483647, %v2278_v1 }
 0x1ea   : > { %v2280_v5 = vpop.eup %2279  ;;  %v958_v6 = vsub.f32 0.0, %v942_v2  ;;  %v943_v7 = vand.u32 2147483647, %v2633_v3  ;;  %vm911_vm11 = vcmp.ne.f32.partialorder %v2633_v3, %v2633_v3 }
 0x1eb   : > { %2285 = vlog2.f32 %v1002_v4  ;;  %v1011_v8 = vadd.f32 1.0, %v2280_v5  ;;  %v1014_v15 = vmul.f32 -0.5, %v2280_v5  ;;  %v1006_v31 = vadd.f32 1.0, %v1005_v12 }
 0x1ec   : > { %v978_v9 = vmul.f32 1.442695, %v958_v6  ;;  %v959_v10 = vsub.f32 0.0, %v943_v7  ;;  %v841_v11 = vpop.f32.mrb[12].mxu1  ;;  %vm2663_vm1 = vcmp.lt.f32.partialorder %v1008_v22, 0.0004427343 }
 0x1ed   : > { %2287 = vlog2.f32 %v1011_v8  ;;  %v843_v14 = vpop.f32.mrb[13].mxu1  ;;  %v2639_v16 = vadd.f32 %v841_v11, %v2559_v26  ;;  %v1015_v40 = vadd.f32 1.0, %v1014_v15  ;;  %v1017_v50 = vand.u32 2147483647, %v2280_v5 }
 0x1ee   : > { %2289 = vpow2.f32 %v978_v9  ;;  %v980_v13 = vmul.f32 1.442695, %v959_v10  ;;  %v2642_v17 = vadd.f32 %v843_v14, %v2562_v27  ;;  %v845_v18 = vpop.f32.mrb[14].mxu1  ;;  %v1007_v56 = vmul.f32 %v2278_v1, %v1006_v31 }
 0x1ef   : > { %v2647_v23 = vadd.f32 %v845_v18, %v2559_v26  ;;  %v847_v24 = vpop.f32.mrb[15].mxu1  ;;  %1776 = vst [vmem:[%s2572_s24 + $0x98] sm:$0xff] %v2639_v16  ;;  %v1016_v62 = vmul.f32 %v2280_v5, %v1015_v40  ;;  %vm1018_vm3 = vcmp.lt.f32.partialorder %v1017_v50, 0.0004427343  ;;  %v893_v31 = vmax.f32 %v2617_v52, 0.0 }
 0x1f0   : > { %v2644_v19 = vpop.eup %2281  ;;  %2291 = vpow2.f32 %v980_v13  ;;  %v944_v33 = vand.u32 2147483647, %v2642_v17  ;;  %v2656_v35 = vadd.f32 %v847_v24, %v2562_v27  ;;  %vm912_vm12 = vcmp.ne.f32.partialorder %v2642_v17, %v2642_v17 }
 0x1f1   : > { %v1020_v29 = vadd.f32 1.0, %v2644_v19  ;;  %1777 = vst [vmem:[%s2572_s24 + $0xb0] sm:$0xff] %v2647_v23  ;;  %v1023_v57 = vmul.f32 -0.5, %v2644_v19  ;;  %v1026_v5 = vand.u32 2147483647, %v2644_v19 }
 0x1f2   : > { %v2658_v37 = vpop.eup %2283  ;;  %v960_v45 = vsub.f32 0.0, %v944_v33  ;;  %v945_v53 = vand.u32 2147483647, %v2656_v35  ;;  %vm913_vm15 = vcmp.ne.f32.partialorder %v2656_v35, %v2656_v35 }
 0x1f3   : > { %2293 = vlog2.f32 %v1020_v29  ;;  %v1029_v43 = vadd.f32 1.0, %v2658_v37  ;;  %v1032_v9 = vmul.f32 -0.5, %v2658_v37  ;;  %v1024_v15 = vadd.f32 1.0, %v1023_v57 }
 0x1f4   : > { %v851_v46 = vpop.f32.mrb[16].mxu1  ;;  %v982_v0 = vmul.f32 1.442695, %v960_v45  ;;  %v961_v2 = vsub.f32 0.0, %v945_v53  ;;  %vm2716_vm5 = vcmp.lt.f32.partialorder %v1026_v5, 0.0004427343 }
 0x1f5   : > { %v2286_v48 = vpop.eup %2285  ;;  %v853_v54 = vpop.f32.mrb[17].mxu1  ;;  %2295 = vlog2.f32 %v1029_v43  ;;  %v2675_v4 = vadd.f32 %v851_v46, %v2559_v26  ;;  %v1033_v33 = vadd.f32 1.0, %v1032_v9 }
 0x1f6   : > { %v1004_v55 = vmul.f32 0.6931472, %v2286_v48  ;;  %v855_v59 = vpop.f32.mrb[18].mxu1  ;;  %2297 = vpow2.f32 %v982_v0  ;;  %v984_v18 = vmul.f32 1.442695, %v961_v2  ;;  %v2702_v29 = vadd.f32 %v853_v54, %v2562_v27 }
 0x1f7   : > { %v2288_v61 = vpop.eup %2287  ;;  %v857_v6 = vpop.f32.mrb[19].mxu1  ;;  %v2683_v10 = vadd.f32 %v855_v59, %v2559_v26  ;;  %1778 = vst [vmem:[%s2572_s24 + $0xc8] sm:$0xff] %v2675_v4  ;;  %v1025_v48 = vmul.f32 %v2644_v19, %v1024_v15 }
 0x1f8   : > { %v2677_v7 = vpop.eup %2289  ;;  %v1010_v8 = vsel %vm2663_vm1, %v1007_v56, %v1004_v55  ;;  %v1013_v1 = vmul.f32 0.6931472, %v2288_v61  ;;  %v946_v54 = vand.u32 2147483647, %v2702_v29  ;;  %v2730_v55 = vadd.f32 %v857_v6, %v2562_v27 }
 0x1f9   : > { %v1146_v11 = vadd.f32 %v1010_v8, %v890_v39  ;;  %v1038_v12 = vadd.f32 1.0, %v2677_v7  ;;  %1779 = vst [vmem:[%s2572_s24 + $0xe0] sm:$0xff] %v2683_v10  ;;  %v894_v39 = vmax.f32 %v2624_v60, 0.0  ;;  %v1041_v43 = vmul.f32 -0.5, %v2677_v7  ;;  %v1180_v8 = vld [vmem:[%s2738_s12 + $0x10] sm:$0xff] }
 0x1fa   : > { %v2689_v13 = vpop.eup %2291  ;;  %v1019_v14 = vsel %vm1018_vm3, %v1016_v62, %v1013_v1  ;;  %v1034_v61 = vmul.f32 %v2658_v37, %v1033_v33  ;;  %v1044_v62 = vand.u32 2147483647, %v2677_v7 }
 0x1fb   : > { %v2699_v22 = vsel %vm906_vm0, %v2580_v32, %v1146_v11  ;;  %v1147_v24 = vadd.f32 %v1019_v14, %v891_v42  ;;  %2299 = vlog2.f32 %v1038_v12  ;;  %v1047_v40 = vadd.f32 1.0, %v2689_v13 }
 0x1fc   : > { %1786 = vst [vmem:[%s2572_s24 + $0x10] sm:$0xff] %v2699_v22  ;;  %2301 = vpow2.f32 %v984_v18  ;;  %v861_v45 = vpop.f32.mrb[20].mxu1  ;;  %v1050_v53 = vmul.f32 -0.5, %v2689_v13  ;;  %v1042_v9 = vadd.f32 1.0, %v1041_v43  ;;  %v962_v11 = vsub.f32 0.0, %v946_v54 }
 0x1fd   : > { %v2294_v41 = vpop.eup %2293  ;;  %v2713_v32 = vsel %vm907_vm2, %v2594_v38, %v1147_v24  ;;  %v1035_v38 = vand.u32 2147483647, %v2658_v37  ;;  %2303 = vlog2.f32 %v1047_v40  ;;  %v863_v50 = vpop.f32.mrb[21].mxu1  ;;  %v2733_v56 = vadd.f32 %v861_v45, %v2559_v26  ;;  %v1181_v40 = vld [vmem:[%s2738_s12 + $0x18] sm:$0xff] }
 0x1fe   : > { %1787 = vst [vmem:[%s2572_s24 + $0x28] sm:$0xff] %v2713_v32  ;;  %v1022_v46 = vmul.f32 0.6931472, %v2294_v41  ;;  %v865_v57 = vpop.f32.mrb[22].mxu1  ;;  %v947_v37 = vand.u32 2147483647, %v2730_v55  ;;  %v2756_v5 = vadd.f32 %v863_v50, %v2562_v27  ;;  %vm914_vm0 = vcmp.ne.f32.partialorder %v2702_v29, %v2702_v29 }
 0x1ff   : > { %v2296_v59 = vpop.eup %2295  ;;  %v2745_v0 = vadd.f32 %v865_v57, %v2559_v26  ;;  %v867_v2 = vpop.f32.mrb[23].mxu1  ;;  %1780 = vst [vmem:[%s2572_s24 + $0xf8] sm:$0xff] %v2733_v56  ;;  %vm1036_vm7 = vcmp.lt.f32.partialorder %v1035_v38, 0.0004427343  ;;  %v1051_v14 = vadd.f32 1.0, %v1050_v53  ;;  %v1178_v38 = vld [vmem:[%s2738_s12] sm:$0xff]  ;;  %vm915_vm2 = vcmp.ne.f32.partialorder %v2730_v55, %v2730_v55 }
 0x200   : > { %v1028_v19 = vsel %vm2716_vm5, %v1025_v48, %v1022_v46  ;;  %v1031_v1 = vmul.f32 0.6931472, %v2296_v59  ;;  %v986_v15 = vmul.f32 1.442695, %v962_v11  ;;  %v2764_v18 = vpop.eup %2297  ;;  %vm2768_vm9 = vcmp.lt.f32.partialorder %v1044_v62, 0.0004427343 }
 0x201   : > { %v1148_v6 = vadd.f32 %v1028_v19, %v892_v51  ;;  %1781 = vst [vmem:[%s2572_s24 + $0x110] sm:$0xff] %v2745_v0  ;;  %v963_v42 = vsub.f32 0.0, %v947_v37  ;;  %v1053_v46 = vand.u32 2147483647, %v2689_v13  ;;  %v1056_v48 = vadd.f32 1.0, %v2764_v18 }
 0x202   : > { %v1037_v12 = vsel %vm1036_vm7, %v1034_v61, %v1031_v1  ;;  %2305 = vpow2.f32 %v986_v15  ;;  %v948_v57 = vand.u32 2147483647, %v2756_v5  ;;  %v1052_v61 = vmul.f32 %v2689_v13, %v1051_v14  ;;  %v1179_v15 = vld [vmem:[%s2738_s12 + $0x8] sm:$0xff] }
 0x203   : > { %v1164_v51 = vsel %vm908_vm4, %v2606_v47, %v1148_v6  ;;  %v1149_v33 = vadd.f32 %v1037_v12, %v893_v31  ;;  %v1043_v47 = vmul.f32 %v2677_v7, %v1042_v9  ;;  %2307 = vlog2.f32 %v1056_v48 }
 0x204   : > { %v1196_v24 = vmul.f32 %v1180_v8, %v1164_v51  ;;  %1788 = vst [vmem:[%s2572_s24 + $0x40] sm:$0xff] %v1164_v51  ;;  %v871_v43 = vpop.f32.mrb[24].mxu1  ;;  %v988_v62 = vmul.f32 1.442695, %v963_v42  ;;  %v1059_v8 = vmul.f32 -0.5, %v2764_v18  ;;  %v1194_v9 = vmul.f32 %v1178_v38, %v2699_v22 }
 0x205   : > { %v2300_v45 = vpop.eup %2299  ;;  %v873_v50 = vpop.f32.mrb[25].mxu1  ;;  %v1165_v53 = vsel %vm909_vm6, %v2617_v52, %v1149_v33  ;;  %v2801_v51 = vadd.f32 %v867_v2, %v2562_v27  ;;  %v895_v12 = vmax.f32 %v2633_v3, 0.0  ;;  %vm1054_vm10 = vcmp.lt.f32.partialorder %v1053_v46, 0.0004427343 }
 0x206   : > { %v2777_v31 = vadd.f32 %v1196_v24, %v2603_v44  ;;  %v1040_v54 = vmul.f32 0.6931472, %v2300_v45  ;;  %v875_v7 = vpop.f32.mrb[26].mxu1  ;;  %v2784_v59 = vpop.eup %2301  ;;  %v1197_v19 = vmul.f32 %v1181_v40, %v1165_v53  ;;  %1789 = vst [vmem:[%s2572_s24 + $0x58] sm:$0xff] %v1165_v53  ;;  %v964_v14 = vsub.f32 0.0, %v948_v57 }
 0x207   : > { %v877_v44 = vpop.f32.mrb[27].mxu1  ;;  %v2304_v6 = vpop.eup %2303  ;;  %v1065_v1 = vadd.f32 1.0, %v2784_v59  ;;  %v1060_v2 = vadd.f32 1.0, %v1059_v8  ;;  %v1068_v24 = vmul.f32 -0.5, %v2784_v59  ;;  %v949_v41 = vand.u32 2147483647, %v2801_v51 }
 0x208   : > { %1756 = vst [vmem:[%s2572_s24 + $0x30] sm:$0xff] %v2777_v31  ;;  %v1046_v52 = vsel %vm2768_vm9, %v1043_v47, %v1040_v54  ;;  %v2796_v13 = vadd.f32 %v1197_v19, %v2611_v49  ;;  %v1049_v37 = vmul.f32 0.6931472, %v2304_v6  ;;  %v990_v33 = vmul.f32 1.442695, %v964_v14 }
 0x209   : > { %v1150_v11 = vadd.f32 %v1046_v52, %v894_v39  ;;  %2309 = vlog2.f32 %v1065_v1  ;;  %v1195_v42 = vmul.f32 %v1179_v15, %v2713_v32  ;;  %v1210_v45 = vadd.f32 %v1194_v9, %v2576_v30 }
 0x20a   : > { %1757 = vst [vmem:[%s2572_s24 + $0x48] sm:$0xff] %v2796_v13  ;;  %v1055_v22 = vsel %vm1054_vm10, %v1052_v61, %v1049_v37  ;;  %2311 = vpow2.f32 %v988_v62  ;;  %v2828_v48 = vadd.f32 %v873_v50, %v2562_v27  ;;  %v2831_v38 = vadd.f32 %v875_v7, %v2559_v26 }
 0x20b   : > { %v2811_v49 = vsel %vm910_vm8, %v2624_v60, %v1150_v11  ;;  %v1151_v39 = vadd.f32 %v1055_v22, %v895_v12  ;;  %v2820_v60 = vadd.f32 %v871_v43, %v2559_v26  ;;  %2313 = vpow2.f32 %v990_v33  ;;  %1754 = vst [vmem:[%s2572_s24] sm:$0xff] %v1210_v45 }
 0x20c   : > { %1790 = vst [vmem:[%s2572_s24 + $0x70] sm:$0xff] %v2811_v49  ;;  %v881_v40 = vpop.f32.mrb[28].mxu1  ;;  %v2835_v43 = vpop.eup %2305  ;;  %v1062_v30 = vand.u32 2147483647, %v2764_v18  ;;  %v965_v32 = vsub.f32 0.0, %v949_v41  ;;  %v896_v57 = vmax.f32 %v2642_v17, 0.0  ;;  %v2854_v61 = vadd.f32 %v877_v44, %v2562_v27 }
 0x20d   : > { %v883_v47 = vpop.f32.mrb[29].mxu1  ;;  %v2825_v46 = vsel %vm911_vm11, %v2633_v3, %v1151_v39  ;;  %1782 = vst [vmem:[%s2572_s24 + $0x128] sm:$0xff] %v2820_v60  ;;  %v1211_v3 = vadd.f32 %v1195_v42, %v2585_v34  ;;  %v2845_v50 = vadd.f32 %v881_v40, %v2559_v26  ;;  %v1069_v7 = vadd.f32 1.0, %v1068_v24  ;;  %1783 = vst [vmem:[%s2572_s24 + $0x140] sm:$0xff] %v2831_v38  ;;  %v2308_v62 = vpop.eup %2307 }
 0x20e   : > { %v2833_v53 = vpop.f32.mrb[30].mxu1  ;;  %1791 = vst [vmem:[%s2572_s24 + $0x88] sm:$0xff] %v2825_v46  ;;  %v1074_v19 = vadd.f32 1.0, %v2835_v43  ;;  %v992_v34 = vmul.f32 1.442695, %v965_v32  ;;  %v1061_v1 = vmul.f32 %v2764_v18, %v1060_v2  ;;  %v897_v44 = vmax.f32 %v2656_v35, 0.0 }
 0x20f   : > { %v2847_v54 = vpop.f32.mrb[31].mxu1  ;;  %v1226_v6 = vpack.c.bf16 %v1211_v3, %v1210_v45  ;;  %1755 = vst [vmem:[%s2572_s24 + $0x18] sm:$0xff] %v1211_v3  ;;  %v950_v52 = vand.u32 2147483647, %v2828_v48  ;;  %1784 = vst [vmem:[%s2572_s24 + $0x158] sm:$0xff] %v2845_v50  ;;  %v1070_v14 = vmul.f32 %v2784_v59, %v1069_v7  ;;  %v1227_v22 = vpack.c.bf16 %v2796_v13, %v2777_v31 }
 0x210   : > { %v1058_v8 = vmul.f32 0.6931472, %v2308_v62  ;;  %v1071_v9 = vand.u32 2147483647, %v2784_v59  ;;  %2315 = vlog2.f32 %v1074_v19  ;;  %vm1063_vm13 = vcmp.lt.f32.partialorder %v1062_v30, 0.0004427343 }
 0x211   : > { %2317 = vpow2.f32 %v992_v34  ;;  %2147 = vmatprep.mubr.bf16.mxu0 %v1226_v6  ;;  %v966_v11 = vsub.f32 0.0, %v950_v52  ;;  %v951_v15 = vand.u32 2147483647, %v2854_v61  ;;  %v1077_v24 = vmul.f32 -0.5, %v2835_v43  ;;  %v1182_v19 = vld [vmem:[%s2738_s12 + $0x20] sm:$0xff]  ;;  %v1183_v62 = vld [vmem:[%s2738_s12 + $0x28] sm:$0xff] }
 0x212   : > { %v1064_v12 = vsel %vm1063_vm13, %v1061_v1, %v1058_v8  ;;  %vm1072_vm14 = vcmp.lt.f32.partialorder %v1071_v9, 0.0004427343  ;;  %2148 = vmatmul.mubr.bf16.vlgmr.msra.gmra.mrb[16].mxu0 %v1227_v22  ;;  %v2874_v59 = vadd.f32 %v883_v47, %v2562_v27  ;;  %v1080_v30 = vand.u32 2147483647, %v2835_v43 }
 0x213   : > { %v2310_v37 = vpop.eup %2309  ;;  %v1152_v39 = vadd.f32 %v1064_v12, %v896_v57  ;;  %v994_v33 = vmul.f32 1.442695, %v966_v11  ;;  %v967_v41 = vsub.f32 0.0, %v951_v15  ;;  %2164 = vmatpush3.bf16.msra.mxu0 %v2538_v20  ;;  %v898_v3 = vmax.f32 %v2702_v29, 0.0  ;;  %v1184_v11 = vld [vmem:[%s2738_s12 + $0x30] sm:$0xff] }
 0x214   : > { %v2869_v18 = vpop.eup %2311  ;;  %v1067_v2 = vmul.f32 0.6931472, %v2310_v37  ;;  %2165 = vmatprep.subr.bf16.mxu0 %v2544_v21  ;;  %v952_v7 = vand.u32 2147483647, %v2874_v59  ;;  %v899_v34 = vmax.f32 %v2730_v55, 0.0  ;;  %v2910_v1 = vadd.f32 %v2847_v54, %v2562_v27 }
 0x215   : > { %v1083_v40 = vadd.f32 1.0, %v2869_v18  ;;  %v1168_v31 = vsel %vm912_vm12, %v2642_v17, %v1152_v39  ;;  %2319 = vpow2.f32 %v994_v33  ;;  %v2881_v42 = vpop.eup %2313  ;;  %v1078_v17 = vadd.f32 1.0, %v1077_v24 }
 0x216   : > { %v1073_v13 = vsel %vm1072_vm14, %v1070_v14, %v1067_v2  ;;  %1792 = vst [vmem:[%s2572_s24 + $0xa0] sm:$0xff] %v1168_v31  ;;  %v1092_v47 = vadd.f32 1.0, %v2881_v42  ;;  %v996_v32 = vmul.f32 1.442695, %v967_v41  ;;  %v1086_v57 = vmul.f32 -0.5, %v2869_v18 }
 0x217   : > { %v1153_v45 = vadd.f32 %v1073_v13, %v897_v44  ;;  %2321 = vlog2.f32 %v1083_v40  ;;  %2166 = vmatpush3.bf16.msra.mxu0 %v2544_v21  ;;  %vm2904_vm1 = vcmp.lt.f32.partialorder %v1080_v30, 0.0004427343  ;;  %v968_v8 = vsub.f32 0.0, %v952_v7 }
 0x218   : > { %2323 = vlog2.f32 %v1092_v47  ;;  %2167 = vmatprep.subr.bf16.mxu0 %v2555_v25  ;;  %v1198_v21 = vmul.f32 %v1182_v19, %v2811_v49  ;;  %v1087_v37 = vadd.f32 1.0, %v1086_v57  ;;  %v1095_v12 = vmul.f32 -0.5, %v2881_v42 }
 0x219   : > { %v1169_v20 = vsel %vm913_vm15, %v2656_v35, %v1153_v45  ;;  %v2901_v35 = vadd.f32 %v2833_v53, %v2559_v26  ;;  %2325 = vpow2.f32 %v996_v32  ;;  %v1079_v26 = vmul.f32 %v2835_v43, %v1078_v17  ;;  %v1186_v17 = vld [vmem:[%s2738_s12 + $0x40] sm:$0xff] }
 0x21a   : > { %1793 = vst [vmem:[%s2572_s24 + $0xb8] sm:$0xff] %v1169_v20  ;;  %v2316_v6 = vpop.eup %2315  ;;  %v1199_v53 = vmul.f32 %v1183_v62, %v2825_v46  ;;  %v998_v54 = vmul.f32 1.442695, %v968_v8  ;;  %v1089_v43 = vand.u32 2147483647, %v2869_v18  ;;  %v900_v49 = vmax.f32 %v2756_v5, 0.0 }
 0x21b   : > { %v2913_v9 = vpop.eup %2317  ;;  %v1076_v44 = vmul.f32 0.6931472, %v2316_v6  ;;  %1785 = vst [vmem:[%s2572_s24 + $0x170] sm:$0xff] %v2901_v35  ;;  %v953_v46 = vand.u32 2147483647, %v2910_v1  ;;  %2168 = vmatpush3.bf16.msra.mxu0 %v2555_v25  ;;  %v1200_v39 = vmul.f32 %v1184_v11, %v1168_v31  ;;  %v1214_v33 = vadd.f32 %v1198_v21, %v2621_v58  ;;  %v1185_v25 = vld [vmem:[%s2738_s12 + $0x38] sm:$0xff] }
 0x21c   : > { %v1101_v27 = vadd.f32 1.0, %v2913_v9  ;;  %v1098_v22 = vand.u32 2147483647, %v2881_v42  ;;  %2169 = vmatprep.subr.bf16.mxu0 %v2567_v28  ;;  %v1215_v40 = vadd.f32 %v1199_v53, %v2629_v63  ;;  %v1088_v31 = vmul.f32 %v2869_v18, %v1087_v37 }
 0x21d   : > { %v1082_v14 = vsel %vm2904_vm1, %v1079_v26, %v1076_v44  ;;  %v969_v24 = vsub.f32 0.0, %v953_v46  ;;  %v1096_v45 = vadd.f32 1.0, %v1095_v12  ;;  %v1104_v32 = vmul.f32 -0.5, %v2913_v9  ;;  %1758 = vst [vmem:[%s2572_s24 + $0x60] sm:$0xff] %v1214_v33  ;;  %v1187_v26 = vld [vmem:[%s2738_s12 + $0x48] sm:$0xff]  ;;  %v1188_v12 = vld [vmem:[%s2738_s12 + $0x50] sm:$0xff] }
 0x21e   : > { %v1154_v15 = vadd.f32 %v1082_v14, %v898_v3  ;;  %2327 = vlog2.f32 %v1101_v27  ;;  %v1228_v3 = vpack.c.bf16 %v1215_v40, %v1214_v33  ;;  %1759 = vst [vmem:[%s2572_s24 + $0x78] sm:$0xff] %v1215_v40  ;;  %vm1090_vm3 = vcmp.lt.f32.partialorder %v1089_v43, 0.0004427343 }
 0x21f   : > { %v2933_v2 = vpop.eup %2319  ;;  %2329 = vpow2.f32 %v998_v54  ;;  %v1000_v58 = vmul.f32 1.442695, %v969_v24  ;;  %2170 = vmatpush3.bf16.msra.mxu0 %v2567_v28  ;;  %v1201_v63 = vmul.f32 %v1185_v25, %v1169_v20  ;;  %vm2952_vm4 = vcmp.lt.f32.partialorder %v1098_v22, 0.0004427343  ;;  %v1189_v25 = vld [vmem:[%s2738_s12 + $0x58] sm:$0xff] }
 0x220   : > { %v1170_v13 = vsel %vm914_vm0, %v2702_v29, %v1154_v15  ;;  %v1110_v30 = vadd.f32 1.0, %v2933_v2  ;;  %v1216_v29 = vadd.f32 %v1200_v39, %v2639_v16  ;;  %2171 = vmatprep.subr.bf16.mxu0 %v2590_v36  ;;  %2151 = vmatprep.mubr.bf16.mxu0 %v1228_v3  ;;  %v1097_v20 = vmul.f32 %v2881_v42, %v1096_v45 }
 0x221   : > { %v2322_v41 = vpop.eup %2321  ;;  %1794 = vst [vmem:[%s2572_s24 + $0xd0] sm:$0xff] %v1170_v13  ;;  %v1202_v19 = vmul.f32 %v1186_v17, %v1170_v13  ;;  %v1217_v6 = vadd.f32 %v1201_v63, %v2647_v23  ;;  %v1105_v52 = vadd.f32 1.0, %v1104_v32  ;;  %v1113_v8 = vmul.f32 -0.5, %v2933_v2 }
 0x222   : > { %v1085_v47 = vmul.f32 0.6931472, %v2322_v41  ;;  %2331 = vlog2.f32 %v1110_v30  ;;  %v2324_v18 = vpop.eup %2323  ;;  %1760 = vst [vmem:[%s2572_s24 + $0x90] sm:$0xff] %v1216_v29  ;;  %vm916_vm5 = vcmp.ne.f32.partialorder %v2756_v5, %v2756_v5  ;;  %vm917_vm7 = vcmp.ne.f32.partialorder %v2801_v51, %v2801_v51 }
 0x223   : > { %2333 = vpow2.f32 %v1000_v58  ;;  %v2956_v62 = vpop.eup %2325  ;;  %v1094_v16 = vmul.f32 0.6931472, %v2324_v18  ;;  %v1218_v21 = vadd.f32 %v1202_v19, %v2675_v4  ;;  %2172 = vmatpush3.bf16.msra.mxu0 %v2590_v36  ;;  %v1229_v53 = vpack.c.bf16 %v1217_v6, %v1216_v29  ;;  %1761 = vst [vmem:[%s2572_s24 + $0xa8] sm:$0xff] %v1217_v6 }
 0x224   : > { %v1091_v57 = vsel %vm1090_vm3, %v1088_v31, %v1085_v47  ;;  %v1119_v44 = vadd.f32 1.0, %v2956_v62  ;;  %v901_v36 = vmax.f32 %v2801_v51, 0.0  ;;  %v1106_v43 = vmul.f32 %v2913_v9, %v1105_v52 }
 0x225   : > { %v1155_v28 = vadd.f32 %v1091_v57, %v899_v34  ;;  %v1100_v23 = vsel %vm2952_vm4, %v1097_v20, %v1094_v16  ;;  %v1107_v34 = vand.u32 2147483647, %v2913_v9  ;;  %1762 = vst [vmem:[%s2572_s24 + $0xc0] sm:$0xff] %v1218_v21  ;;  %2152 = vmatmul.mubr.bf16.gmra.mrb[20].mxu0 %v1229_v53  ;;  %v1122_v46 = vmul.f32 -0.5, %v2956_v62 }
 0x226   : > { %v1156_v11 = vadd.f32 %v1100_v23, %v900_v49  ;;  %2335 = vlog2.f32 %v1119_v44  ;;  %v1114_v49 = vadd.f32 1.0, %v1113_v8  ;;  %v902_v9 = vmax.f32 %v2828_v48, 0.0 }
 0x227   : > { %v1171_v42 = vsel %vm915_vm2, %v2730_v55, %v1155_v28  ;;  %v1116_v55 = vand.u32 2147483647, %v2933_v2  ;;  %vm1108_vm6 = vcmp.lt.f32.partialorder %v1107_v34, 0.0004427343  ;;  %v1123_v17 = vadd.f32 1.0, %v1122_v46  ;;  %v1193_v46 = vld [vmem:[%s2738_s12 + $0x78] sm:$0xff] }
 0x228   : > { %1795 = vst [vmem:[%s2572_s24 + $0xe8] sm:$0xff] %v1171_v42  ;;  %v2328_v4 = vpop.eup %2327  ;;  %v1203_v37 = vmul.f32 %v1187_v26, %v1171_v42  ;;  %v1172_v54 = vsel %vm916_vm5, %v2756_v5, %v1156_v11  ;;  %v1115_v13 = vmul.f32 %v2933_v2, %v1114_v49  ;;  %v1125_v47 = vand.u32 2147483647, %v2956_v62 }
 0x229   : > { %v2983_v27 = vpop.eup %2329  ;;  %v1103_v14 = vmul.f32 0.6931472, %v2328_v4  ;;  %1796 = vst [vmem:[%s2572_s24 + $0x100] sm:$0xff] %v1172_v54  ;;  %v1204_v24 = vmul.f32 %v1188_v12, %v1172_v54  ;;  %vm2994_vm8 = vcmp.lt.f32.partialorder %v1116_v55, 0.0004427343  ;;  %vm918_vm9 = vcmp.ne.f32.partialorder %v2828_v48, %v2828_v48 }
 0x22a   : > { %v1128_v15 = vadd.f32 1.0, %v2983_v27  ;;  %v1219_v22 = vadd.f32 %v1203_v37, %v2683_v10  ;;  %v1131_v3 = vmul.f32 -0.5, %v2983_v27  ;;  %v1124_v19 = vmul.f32 %v2956_v62, %v1123_v17 }
 0x22b   : > { %v1109_v39 = vsel %vm1108_vm6, %v1106_v43, %v1103_v14  ;;  %v1220_v45 = vadd.f32 %v1204_v24, %v2733_v56  ;;  %v1190_v56 = vld [vmem:[%s2738_s12 + $0x60] sm:$0xff]  ;;  %vm1126_vm10 = vcmp.lt.f32.partialorder %v1125_v47, 0.0004427343  ;;  %v1134_v8 = vand.u32 2147483647, %v2983_v27 }
 0x22c   : > { %v2332_v5 = vpop.eup %2331  ;;  %v1157_v33 = vadd.f32 %v1109_v39, %v901_v36  ;;  %2337 = vlog2.f32 %v1128_v15  ;;  %1763 = vst [vmem:[%s2572_s24 + $0xd8] sm:$0xff] %v1219_v22  ;;  %v1230_v31 = vpack.c.bf16 %v1219_v22, %v1218_v21  ;;  %v1132_v28 = vadd.f32 1.0, %v1131_v3 }
 0x22d   : > { %v2334_v41 = vpop.eup %2333  ;;  %v1112_v10 = vmul.f32 0.6931472, %v2332_v5  ;;  %1764 = vst [vmem:[%s2572_s24 + $0xf0] sm:$0xff] %v1220_v45  ;;  %vm919_vm11 = vcmp.ne.f32.partialorder %v2854_v61, %v2854_v61  ;;  %v904_v34 = vmax.f32 %v2874_v59, 0.0  ;;  %vm1135_vm12 = vcmp.lt.f32.partialorder %v1134_v8, 0.0004427343 }
 0x22e   : > { %v1173_v30 = vsel %vm917_vm7, %v2801_v51, %v1157_v33  ;;  %v1137_v32 = vadd.f32 1.0, %v2334_v41  ;;  %2155 = vmatprep.mubr.bf16.mxu0 %v1230_v31  ;;  %v903_v51 = vmax.f32 %v2854_v61, 0.0  ;;  %v1140_v16 = vmul.f32 -0.5, %v2334_v41  ;;  %v2274_v5 = vld [vmem:[%s3122_s8 + $0x28] sm:$0xff]  }
 0x22f   : > { %1797 = vst [vmem:[%s2572_s24 + $0x118] sm:$0xff] %v1173_v30  ;;  %v1118_v58 = vsel %vm2994_vm8, %v1115_v13, %v1112_v10  ;;  %v1205_v63 = vmul.f32 %v1189_v25, %v1173_v30  ;;  %v1133_v42 = vmul.f32 %v2983_v27, %v1132_v28  ;;  %v1143_v53 = vand.u32 2147483647, %v2334_v41  ;;  %2173 = vmatprep.subr.bf16.mxu0 %v2274_v5 }
 0x230   : > { %v1158_v2 = vadd.f32 %v1118_v58, %v902_v9  ;;  %2339 = vlog2.f32 %v1137_v32  ;;  %v2336_v29 = vpop.eup %2335  ;;  %v1141_v23 = vadd.f32 1.0, %v1140_v16  ;;  %vm920_vm13 = vcmp.ne.f32.partialorder %v2874_v59, %v2874_v59  ;;  %2200 = vmatprep.subr.bf16.mxu1 %v2274_v5  ;;  %2174 = vmatpush3.bf16.msra.mxu0 %v2274_v5 }
 0x231   : > { %v1221_v18 = vadd.f32 %v1205_v63, %v2745_v0  ;;  %v1121_v7 = vmul.f32 0.6931472, %v2336_v29  ;;  %v1191_v0 = vld [vmem:[%s2738_s12 + $0x68] sm:$0xff]  ;;  %v905_v54 = vmax.f32 %v2910_v1, 0.0  ;;  %vm1144_vm14 = vcmp.lt.f32.partialorder %v1143_v53, 0.0004427343  ;;  %2208 = vmatpush3.bf16.msra.mxu1 %v2274_v5 }
 0x232   : > { %v1174_v57 = vsel %vm918_vm9, %v2828_v48, %v1158_v2  ;;  %v1142_v12 = vmul.f32 %v2334_v41, %v1141_v23  ;;  %vm921_vm15 = vcmp.ne.f32.partialorder %v2910_v1, %v2910_v1 }
 0x233   : > { %1798 = vst [vmem:[%s2572_s24 + $0x130] sm:$0xff] %v1174_v57  ;;  %v1231_v20 = vpack.c.bf16 %v1221_v18, %v1220_v45  ;;  %1765 = vst [vmem:[%s2572_s24 + $0x108] sm:$0xff] %v1221_v18  ;;  %v1206_v6 = vmul.f32 %v1190_v56, %v1174_v57  ;;  %v1127_v52 = vsel %vm1126_vm10, %v1124_v19, %v1121_v7 }
 0x234   : > { %v1159_v44 = vadd.f32 %v1127_v52, %v903_v51 }
 0x235   : > { %2156 = vmatmul.mubr.bf16.gmra.mrb[24].mxu0 %v1231_v20  ;;  %v1222_v48 = vadd.f32 %v1206_v6, %v2820_v60 }
 0x236   : > { %v2338_v26 = vpop.eup %2337  ;;  %v1175_v62 = vsel %vm919_vm11, %v2854_v61, %v1159_v44  ;;  %v1192_v61 = vld [vmem:[%s2738_s12 + $0x70] sm:$0xff] }
 0x237   : > { %v1130_v21 = vmul.f32 0.6931472, %v2338_v26  ;;  %1766 = vst [vmem:[%s2572_s24 + $0x120] sm:$0xff] %v1222_v48  ;;  %1799 = vst [vmem:[%s2572_s24 + $0x148] sm:$0xff] %v1175_v62  ;;  %v1207_v60 = vmul.f32 %v1191_v0, %v1175_v62 }
 0x239   : > { %v1136_v11 = vsel %vm1135_vm12, %v1133_v42, %v1130_v21  ;;  %v1223_v55 = vadd.f32 %v1207_v60, %v2831_v38 }
 0x23a   : > { %v2340_v4 = vpop.eup %2339  ;;  %v1160_v36 = vadd.f32 %v1136_v11, %v904_v34 }
 0x23b   : > { %v1139_v37 = vmul.f32 0.6931472, %v2340_v4  ;;  %v1232_v14 = vpack.c.bf16 %v1223_v55, %v1222_v48  ;;  %1767 = vst [vmem:[%s2572_s24 + $0x138] sm:$0xff] %v1223_v55 }
 0x23c   : > { %v1176_v27 = vsel %vm920_vm13, %v2874_v59, %v1160_v36 }
 0x23d   : > { %1800 = vst [vmem:[%s2572_s24 + $0x160] sm:$0xff] %v1176_v27  ;;  %v1145_v43 = vsel %vm1144_vm14, %v1142_v12, %v1139_v37  ;;  %v1208_v49 = vmul.f32 %v1192_v61, %v1176_v27  ;;  %2159 = vmatprep.mubr.bf16.mxu0 %v1232_v14 }
 0x23e   : > { %v1161_v38 = vadd.f32 %v1145_v43, %v905_v54 }
 0x23f   : > { %v1224_v15 = vadd.f32 %v1208_v49, %v2845_v50  ;;  %v2275_v50 = vld [vmem:[%s3122_s8 + $0x30] sm:$0xff]  }
 0x240   : > { %v1177_v59 = vsel %vm921_vm15, %v2910_v1, %v1161_v38  ;;  %v2276_v1 = vld [vmem:[%s3122_s8 + $0x38] sm:$0xff]   ;;  %2175 = vmatprep.subr.bf16.mxu0 %v2275_v50  ;;  %2201 = vmatprep.subr.bf16.mxu1 %v2275_v50 }
 0x241   : > { %1801 = vst [vmem:[%s2572_s24 + $0x178] sm:$0xff] %v1177_v59  ;;  %v1209_v22 = vmul.f32 %v1193_v46, %v1177_v59  ;;  %1768 = vst [vmem:[%s2572_s24 + $0x150] sm:$0xff] %v1224_v15  ;;  %2176 = vmatpush3.bf16.msra.mxu0 %v2275_v50  ;;  %2209 = vmatpush3.bf16.msra.mxu1 %v2275_v50 }
 0x242   : > { %2177 = vmatprep.subr.bf16.mxu0 %v2276_v1  ;;  %2202 = vmatprep.subr.bf16.mxu1 %v2276_v1 }
 0x243   : > { %v1225_v39 = vadd.f32 %v1209_v22, %v2901_v35  ;;  %v3057_v35 = vld [vmem:[%s3121_s7] ss:$0 sm:$0xff] }
 0x245   : > { %v1233_v24 = vpack.c.bf16 %v1225_v39, %v1224_v15  ;;  %1769 = vst [vmem:[%s2572_s24 + $0x168] sm:$0xff] %v1225_v39  ;;  %2178 = vmatpush3.bf16.msra.mxu0 %v2276_v1  ;;  %2210 = vmatpush3.bf16.msra.mxu1 %v2276_v1 }
 0x247   : > { %2160 = vmatmul.mubr.bf16.gmra.mrb[28].mxu0 %v1233_v24 }
 0x2e5   : > { %v2149_v33 = vpop.f32.mrb[16].mxu0 }
 0x2e6   : > { %v1348_v9 = vadd.f32 %v2149_v33, %v3057_v35  ;;  %v1339_v40 = vpop.f32.mrb[17].mxu0 }
 0x2e7   : > { %v1340_v25 = vadd.f32 %v3057_v35, %v1339_v40  ;;  %v2150_v41 = vpop.f32.mrb[18].mxu0 }
 0x2e8   : > { %v1420_v10 = vmul.f32 0.01, %v1348_v9  ;;  %v1351_v13 = vadd.f32 %v2150_v41, %v3057_v35  ;;  %v1342_v31 = vpop.f32.mrb[19].mxu0  ;;  %vm1404_vm0 = vcmp.gt.f32.partialorder %v1348_v9, 0.0 }
 0x2e9   : > { %v1418_v45 = vmul.f32 0.01, %v1340_v25  ;;  %v1343_v30 = vadd.f32 %v3057_v35, %v1342_v31  ;;  %vm1402_vm1 = vcmp.gt.f32.partialorder %v1340_v25, 0.0 }
 0x2ea   : > { %vm1405_vm2 = vcmp.gt.f32.partialorder %v1351_v13, 0.0  ;;  %v1421_v17 = vmul.f32 0.01, %v1351_v13  ;;  %v1436_v32 = vsel %vm1404_vm0, %v1348_v9, %v1420_v10 }
 0x2eb   : > { %vm1403_vm3 = vcmp.gt.f32.partialorder %v1343_v30, 0.0  ;;  %v1419_v47 = vmul.f32 0.01, %v1343_v30  ;;  %v1434_v63 = vsel %vm1402_vm1, %v1340_v25, %v1418_v45 }
 0x2ec   : > { %v1437_v58 = vsel %vm1405_vm2, %v1351_v13, %v1421_v17 }
 0x2ed   : > { %v1451_v3 = vpack.c.bf16 %v1437_v58, %v1436_v32  ;;  %v1435_v2 = vsel %vm1403_vm3, %v1343_v30, %v1419_v47  ;;  %v3078_v30 = vld [vmem:[%s3123_s9] ss:$0 sm:$0xff] }
 0x2ee   : > { %v1450_v56 = vpack.c.bf16 %v1435_v2, %v1434_v63 }
 0x2f0   : > { %2179 = vmatprep.mubr.bf16.mxu0 %v1450_v56 }
 0x2f1   : > { %2180 = vmatmul.mubr.bf16.vlgmr.msra.gmra.mrb[32].mxu0 %v1451_v3 }
 0x2f8   : > { %v2153_v29 = vpop.f32.mrb[20].mxu0 }
 0x2f9   : > { %v1364_v51 = vadd.f32 %v2153_v29, %v3057_v35  ;;  %v1355_v18 = vpop.f32.mrb[21].mxu0 }
 0x2fa   : > { %v1356_v57 = vadd.f32 %v3057_v35, %v1355_v18  ;;  %v2154_v7 = vpop.f32.mrb[22].mxu0 }
 0x2fb   : > { %v1424_v19 = vmul.f32 0.01, %v1364_v51  ;;  %v1367_v28 = vadd.f32 %v2154_v7, %v3057_v35  ;;  %v1358_v16 = vpop.f32.mrb[23].mxu0  ;;  %vm1408_vm4 = vcmp.gt.f32.partialorder %v1364_v51, 0.0 }
 0x2fc   : > { %v1422_v20 = vmul.f32 0.01, %v1356_v57  ;;  %v1359_v6 = vadd.f32 %v3057_v35, %v1358_v16  ;;  %vm1406_vm5 = vcmp.gt.f32.partialorder %v1356_v57, 0.0 }
 0x2fd   : > { %vm1409_vm6 = vcmp.gt.f32.partialorder %v1367_v28, 0.0  ;;  %v1425_v52 = vmul.f32 0.01, %v1367_v28  ;;  %v1440_v44 = vsel %vm1408_vm4, %v1364_v51, %v1424_v19 }
 0x2fe   : > { %vm1407_vm7 = vcmp.gt.f32.partialorder %v1359_v6, 0.0  ;;  %v1423_v8 = vmul.f32 0.01, %v1359_v6  ;;  %v1438_v48 = vsel %vm1406_vm5, %v1356_v57, %v1422_v20 }
 0x2ff   : > { %v1441_v0 = vsel %vm1409_vm6, %v1367_v28, %v1425_v52 }
 0x300   : > { %v1439_v26 = vsel %vm1407_vm7, %v1359_v6, %v1423_v8  ;;  %v1453_v62 = vpack.c.bf16 %v1441_v0, %v1440_v44 }
 0x301   : > { %v1452_v21 = vpack.c.bf16 %v1439_v26, %v1438_v48 }
 0x303   : > { %2183 = vmatprep.mubr.bf16.mxu0 %v1452_v21 }
 0x304   : > { %2184 = vmatmul.mubr.bf16.gmra.mrb[36].mxu0 %v1453_v62 }
 0x308   : > { %v2157_v42 = vpop.f32.mrb[24].mxu0 }
 0x309   : > { %v1380_v23 = vadd.f32 %v2157_v42, %v3057_v35  ;;  %v1371_v34 = vpop.f32.mrb[25].mxu0 }
 0x30a   : > { %v1372_v53 = vadd.f32 %v3057_v35, %v1371_v34  ;;  %v2158_v60 = vpop.f32.mrb[26].mxu0 }
 0x30b   : > { %v1428_v11 = vmul.f32 0.01, %v1380_v23  ;;  %v1383_v4 = vadd.f32 %v2158_v60, %v3057_v35  ;;  %v1374_v36 = vpop.f32.mrb[27].mxu0  ;;  %vm1412_vm8 = vcmp.gt.f32.partialorder %v1380_v23, 0.0 }
 0x30c   : > { %v1426_v55 = vmul.f32 0.01, %v1372_v53  ;;  %v1375_v61 = vadd.f32 %v3057_v35, %v1374_v36  ;;  %vm1410_vm9 = vcmp.gt.f32.partialorder %v1372_v53, 0.0 }
 0x30d   : > { %vm1413_vm10 = vcmp.gt.f32.partialorder %v1383_v4, 0.0  ;;  %v1429_v37 = vmul.f32 0.01, %v1383_v4  ;;  %v1444_v27 = vsel %vm1412_vm8, %v1380_v23, %v1428_v11 }
 0x30e   : > { %vm1411_vm11 = vcmp.gt.f32.partialorder %v1375_v61, 0.0  ;;  %v1427_v12 = vmul.f32 0.01, %v1375_v61  ;;  %v1442_v43 = vsel %vm1410_vm9, %v1372_v53, %v1426_v55 }
 0x30f   : > { %v1445_v54 = vsel %vm1413_vm10, %v1383_v4, %v1429_v37 }
 0x310   : > { %v1455_v14 = vpack.c.bf16 %v1445_v54, %v1444_v27  ;;  %v1443_v49 = vsel %vm1411_vm11, %v1375_v61, %v1427_v12 }
 0x311   : > { %v1454_v38 = vpack.c.bf16 %v1443_v49, %v1442_v43 }
 0x313   : > { %2187 = vmatprep.mubr.bf16.mxu1 %v1454_v38 }
 0x314   : > { %2188 = vmatmul.mubr.bf16.vlgmr.msra.gmra.mrb[32].mxu1 %v1455_v14 }
 0x31a   : > { %v2161_v46 = vpop.f32.mrb[28].mxu0 }
 0x31b   : > { %v1396_v15 = vadd.f32 %v2161_v46, %v3057_v35  ;;  %v1387_v59 = vpop.f32.mrb[29].mxu0 }
 0x31c   : > { %v1388_v22 = vadd.f32 %v3057_v35, %v1387_v59  ;;  %v2162_v39 = vpop.f32.mrb[30].mxu0 }
 0x31d   : > { %v1432_v24 = vmul.f32 0.01, %v1396_v15  ;;  %v1399_v5 = vadd.f32 %v2162_v39, %v3057_v35  ;;  %v1390_v50 = vpop.f32.mrb[31].mxu0  ;;  %vm1416_vm12 = vcmp.gt.f32.partialorder %v1396_v15, 0.0 }
 0x31e   : > { %v1430_v1 = vmul.f32 0.01, %v1388_v22  ;;  %v1391_v33 = vadd.f32 %v3057_v35, %v1390_v50  ;;  %vm1414_vm13 = vcmp.gt.f32.partialorder %v1388_v22, 0.0 }
 0x31f   : > { %vm1417_vm14 = vcmp.gt.f32.partialorder %v1399_v5, 0.0  ;;  %v1433_v9 = vmul.f32 0.01, %v1399_v5  ;;  %v1448_v25 = vsel %vm1416_vm12, %v1396_v15, %v1432_v24 }
 0x320   : > { %vm1415_vm15 = vcmp.gt.f32.partialorder %v1391_v33, 0.0  ;;  %v1431_v40 = vmul.f32 0.01, %v1391_v33  ;;  %v1446_v10 = vsel %vm1414_vm13, %v1388_v22, %v1430_v1 }
 0x321   : > { %v1449_v41 = vsel %vm1417_vm14, %v1399_v5, %v1433_v9 }
 0x322   : > { %v1447_v13 = vsel %vm1415_vm15, %v1391_v33, %v1431_v40  ;;  %v1457_v31 = vpack.c.bf16 %v1449_v41, %v1448_v25 }
 0x323   : > { %v1456_v45 = vpack.c.bf16 %v1447_v13, %v1446_v10 }
 0x325   : > { %2191 = vmatprep.mubr.bf16.mxu1 %v1456_v45 }
 0x326   : > { %2192 = vmatmul.mubr.bf16.gmra.mrb[36].mxu1 %v1457_v31 }
 0x3c4   : > { %v2181_v17 = vpop.f32.mrb[32].mxu0 }
 0x3c5   : > { %v1572_v35 = vadd.f32 %v2181_v17, %v3078_v30  ;;  %v1563_v47 = vpop.f32.mrb[33].mxu0 }
 0x3c6   : > { %v1564_v32 = vadd.f32 %v3078_v30, %v1563_v47  ;;  %v2182_v58 = vpop.f32.mrb[34].mxu0 }
 0x3c7   : > { %v1644_v3 = vmul.f32 0.01, %v1572_v35  ;;  %v1575_v63 = vadd.f32 %v2182_v58, %v3078_v30  ;;  %v1566_v2 = vpop.f32.mrb[35].mxu0  ;;  %vm1628_vm0 = vcmp.gt.f32.partialorder %v1572_v35, 0.0 }
 0x3c8   : > { %v1642_v56 = vmul.f32 0.01, %v1564_v32  ;;  %v1567_v29 = vadd.f32 %v3078_v30, %v1566_v2  ;;  %vm1626_vm1 = vcmp.gt.f32.partialorder %v1564_v32, 0.0 }
 0x3c9   : > { %vm1629_vm2 = vcmp.gt.f32.partialorder %v1575_v63, 0.0  ;;  %v1645_v51 = vmul.f32 0.01, %v1575_v63  ;;  %v1660_v57 = vsel %vm1628_vm0, %v1572_v35, %v1644_v3 }
 0x3ca   : > { %vm1627_vm3 = vcmp.gt.f32.partialorder %v1567_v29, 0.0  ;;  %v1643_v18 = vmul.f32 0.01, %v1567_v29  ;;  %v1658_v19 = vsel %vm1626_vm1, %v1564_v32, %v1642_v56 }
 0x3cb   : > { %v1661_v7 = vsel %vm1629_vm2, %v1575_v63, %v1645_v51 }
 0x3cc   : > { %v2012_v28 = vpack.c.bf16 %v1661_v7, %v1660_v57  ;;  %v1659_v16 = vsel %vm1627_vm3, %v1567_v29, %v1643_v18 }
 0x3cd   : > { %v2007_v20 = vpack.c.bf16 %v1659_v16, %v1658_v19 }
 0x3ce   : > { %2044 = vst [vmem:[%s3089_s27 + $0x8] sm:$0xff] %v2012_v28  }
 0x3cf   : > { %2008 = vst [vmem:[%s3089_s27] sm:$0xff] %v2007_v20  }
 0x3d7   : > { %v2185_v6 = vpop.f32.mrb[36].mxu0 }
 0x3d8   : > { %v1588_v52 = vadd.f32 %v2185_v6, %v3078_v30  ;;  %v1579_v8 = vpop.f32.mrb[37].mxu0 }
 0x3d9   : > { %v1580_v44 = vadd.f32 %v3078_v30, %v1579_v8  ;;  %v2186_v0 = vpop.f32.mrb[38].mxu0 }
 0x3da   : > { %v1648_v48 = vmul.f32 0.01, %v1588_v52  ;;  %v1591_v26 = vadd.f32 %v2186_v0, %v3078_v30  ;;  %v1582_v62 = vpop.f32.mrb[39].mxu0  ;;  %vm1632_vm4 = vcmp.gt.f32.partialorder %v1588_v52, 0.0 }
 0x3db   : > { %v1646_v21 = vmul.f32 0.01, %v1580_v44  ;;  %v1583_v42 = vadd.f32 %v3078_v30, %v1582_v62  ;;  %vm1630_vm5 = vcmp.gt.f32.partialorder %v1580_v44, 0.0 }
 0x3dc   : > { %vm1633_vm6 = vcmp.gt.f32.partialorder %v1591_v26, 0.0  ;;  %v1649_v23 = vmul.f32 0.01, %v1591_v26  ;;  %v1664_v53 = vsel %vm1632_vm4, %v1588_v52, %v1648_v48 }
 0x3dd   : > { %vm1631_vm7 = vcmp.gt.f32.partialorder %v1583_v42, 0.0  ;;  %v1647_v34 = vmul.f32 0.01, %v1583_v42  ;;  %v1662_v11 = vsel %vm1630_vm5, %v1580_v44, %v1646_v21 }
 0x3de   : > { %v1665_v60 = vsel %vm1633_vm6, %v1591_v26, %v1649_v23 }
 0x3df   : > { %v2022_v4 = vpack.c.bf16 %v1665_v60, %v1664_v53  ;;  %v1663_v36 = vsel %vm1631_vm7, %v1583_v42, %v1647_v34 }
 0x3e0   : > { %v2017_v55 = vpack.c.bf16 %v1663_v36, %v1662_v11 }
 0x3e1   : > { %2046 = vst [vmem:[%s3089_s27 + $0x18] sm:$0xff] %v2022_v4  }
 0x3e2   : > { %2045 = vst [vmem:[%s3089_s27 + $0x10] sm:$0xff] %v2017_v55  }
 0x3e7   : > { %v2189_v61 = vpop.f32.mrb[32].mxu1 }
 0x3e8   : > { %v1604_v37 = vadd.f32 %v2189_v61, %v3078_v30  ;;  %v1595_v12 = vpop.f32.mrb[33].mxu1 }
 0x3e9   : > { %v1596_v27 = vadd.f32 %v3078_v30, %v1595_v12  ;;  %v2190_v54 = vpop.f32.mrb[34].mxu1 }
 0x3ea   : > { %v1652_v14 = vmul.f32 0.01, %v1604_v37  ;;  %v1607_v43 = vadd.f32 %v2190_v54, %v3078_v30  ;;  %v1598_v49 = vpop.f32.mrb[35].mxu1  ;;  %vm1636_vm8 = vcmp.gt.f32.partialorder %v1604_v37, 0.0 }
 0x3eb   : > { %v1650_v38 = vmul.f32 0.01, %v1596_v27  ;;  %v1599_v46 = vadd.f32 %v3078_v30, %v1598_v49  ;;  %vm1634_vm9 = vcmp.gt.f32.partialorder %v1596_v27, 0.0 }
 0x3ec   : > { %vm1637_vm10 = vcmp.gt.f32.partialorder %v1607_v43, 0.0  ;;  %v1653_v15 = vmul.f32 0.01, %v1607_v43  ;;  %v1668_v22 = vsel %vm1636_vm8, %v1604_v37, %v1652_v14 }
 0x3ed   : > { %vm1635_vm11 = vcmp.gt.f32.partialorder %v1599_v46, 0.0  ;;  %v1651_v59 = vmul.f32 0.01, %v1599_v46  ;;  %v1666_v24 = vsel %vm1634_vm9, %v1596_v27, %v1650_v38 }
 0x3ee   : > { %v1669_v39 = vsel %vm1637_vm10, %v1607_v43, %v1653_v15 }
 0x3ef   : > { %v2032_v5 = vpack.c.bf16 %v1669_v39, %v1668_v22  ;;  %v1667_v50 = vsel %vm1635_vm11, %v1599_v46, %v1651_v59 }
 0x3f0   : > { %v2027_v1 = vpack.c.bf16 %v1667_v50, %v1666_v24 }
 0x3f1   : > { %2048 = vst [vmem:[%s3089_s27 + $0x28] sm:$0xff] %v2032_v5  }
 0x3f2   : > { %2047 = vst [vmem:[%s3089_s27 + $0x20] sm:$0xff] %v2027_v1  }
 0x3f9   : > { %v2193_v33 = vpop.f32.mrb[36].mxu1 }
 0x3fa   : > { %v1620_v9 = vadd.f32 %v2193_v33, %v3078_v30  ;;  %v1611_v40 = vpop.f32.mrb[37].mxu1 }
 0x3fb   : > { %v1612_v25 = vadd.f32 %v3078_v30, %v1611_v40  ;;  %v2194_v41 = vpop.f32.mrb[38].mxu1 }
 0x3fc   : > { %v1656_v10 = vmul.f32 0.01, %v1620_v9  ;;  %v1623_v13 = vadd.f32 %v2194_v41, %v3078_v30  ;;  %v1614_v31 = vpop.f32.mrb[39].mxu1  ;;  %vm1640_vm12 = vcmp.gt.f32.partialorder %v1620_v9, 0.0 }
 0x3fd   : > { %v1654_v45 = vmul.f32 0.01, %v1612_v25  ;;  %v1615_v17 = vadd.f32 %v3078_v30, %v1614_v31  ;;  %vm1638_vm13 = vcmp.gt.f32.partialorder %v1612_v25, 0.0 }
 0x3fe   : > { %vm1641_vm14 = vcmp.gt.f32.partialorder %v1623_v13, 0.0  ;;  %v1657_v35 = vmul.f32 0.01, %v1623_v13  ;;  %v1672_v32 = vsel %vm1640_vm12, %v1620_v9, %v1656_v10 }
 0x3ff   : > { %vm1639_vm15 = vcmp.gt.f32.partialorder %v1615_v17, 0.0  ;;  %v1655_v47 = vmul.f32 0.01, %v1615_v17  ;;  %v1670_v3 = vsel %vm1638_vm13, %v1612_v25, %v1654_v45 }
 0x400   : > { %v1673_v58 = vsel %vm1641_vm14, %v1623_v13, %v1657_v35 }
 0x401   : > { %v2042_v63 = vpack.c.bf16 %v1673_v58, %v1672_v32  ;;  %v1671_v2 = vsel %vm1639_vm15, %v1615_v17, %v1655_v47 }
 0x402   : > { %v2037_v56 = vpack.c.bf16 %v1671_v2, %v1670_v3 }
 0x403   : > { %2050 = vst [vmem:[%s3089_s27 + $0x38] sm:$0xff] %v2042_v63  }
 0x404   : > { %2049 = vst [vmem:[%s3089_s27 + $0x30] sm:$0xff] %v2037_v56  }
 0x405 PF: > { %s22_s17 = sadd.s32 1, %s2347_s17  }
 0x406   : > { %p19_p4 = scmp.ge.s32.totalorder %s22_s17, 4  }
 0x408   :  { %21 = sbr.rel (!%p19_p4) target bundleno = 1 (0x1), region = 105 }

</bundles_post_ra>
